<compile_context>
chip_gen: v7x
topology: tpu7x:2x2x1
jax: 0.10.0
libtpu: 0.0.40
codegen_flags: <defaults>
</compile_context>

<pallas_src>
from math import sqrt

import jax
import jax.numpy as jnp
from jax.experimental import pallas as pl
from jax.experimental.pallas import tpu as pltpu

# ----------------------------- model config ---------------------------------
HIDDEN = 128          # hidden_size  (768 in the real model)
ALL_HEAD = 128        # all_head_size (== hidden_size, required by residuals)
NUM_HEADS = 8         # head_num
HEAD_SIZE = ALL_HEAD // NUM_HEADS
N_LAYERS = 1          # n_layers (model default)
BATCH = 2
SEQ = 8
EPS = 1e-12

B_TILE = 8            # batch tile: >= 8 output sublanes -> unmasked vst


def _layernorm(x, gamma, beta, eps=EPS):
    # f32 statistics; rsqrt lowers to the (otherwise idle) EUP slot.
    mu = jnp.mean(x, axis=-1, keepdims=True)
    var = jnp.mean((x - mu) ** 2, axis=-1, keepdims=True)
    return (x - mu) * jax.lax.rsqrt(var + eps) * gamma + beta


def _cross_layer_full(hidden, sbert_before, mask_b, wq, wkv, wo, bo,
                      sa_g, sa_b, ol_g, ol_b):
    """Full-sequence cross-attention layer.

    Only needed when N_LAYERS > 1 (layer i's full output is layer i+1's K/V
    input).  Dead code at trace time when N_LAYERS == 1.
    """
    B, S, H = sbert_before.shape
    A, nh, hs = ALL_HEAD, NUM_HEADS, HEAD_SIZE
    q = jnp.dot(sbert_before.reshape(B * S, H).astype(jnp.bfloat16), wq,
                preferred_element_type=jnp.float32).reshape(B, S, nh, hs)
    kvp = jnp.dot(hidden.reshape(B * S, H).astype(jnp.bfloat16), wkv,
                  preferred_element_type=jnp.float32)            # (B*S, 2A)
    k = kvp[:, :A].reshape(B, S, nh, hs)
    v = kvp[:, A:].reshape(B, S, nh, hs)
    scores = jnp.einsum("bqnh,bknh->bnqk", q, k,
                        preferred_element_type=jnp.float32)
    # PyTorch masks along the *query* axis.
    scores = jnp.where(mask_b[:, None, :, None], -1.0e9, scores)
    scaled = scores / sqrt(float(hs))
    scaled = scaled - jnp.max(scaled, axis=-1, keepdims=True)
    e = jnp.exp(scaled)
    w = e * pl.reciprocal(jnp.sum(e, axis=-1, keepdims=True), approx=True)
    attn = jnp.einsum("bnqk,bknh->bqnh", w, v,
                      preferred_element_type=jnp.float32).reshape(B, S, A)
    attn = _layernorm(attn + sbert_before, sa_g, sa_b)
    out = jnp.dot(attn.reshape(B * S, A).astype(jnp.bfloat16), wo,
                  preferred_element_type=jnp.float32).reshape(B, S, H) + bo
    return _layernorm(out + attn, ol_g, ol_b)


# ------------------------------- kernel --------------------------------------
def composite_kernel(
    sbert_ref,      # (Bt, S, H)  f32   sbert last_hidden_state block
    sql_ref,        # (Bt, S, H)  bf16  sqlbert last_hidden_state block (K/V)
    mask_ref,       # (Bt, S)     f32   sentence_mask (1.0 keep / 0.0 pad)
    wq_ref,         # (H, A)      bf16
    wkv_ref,        # (H, 2A)     bf16  [wk | wv] fused
    wo_ref,         # (A, H)      bf16
    bo_ref,         # (1, H)      f32
    sa_g_ref, sa_b_ref,   # (1, H) sa_layer_norm
    ol_g_ref, ol_b_ref,   # (1, H) cross-layer output_layer_norm
    fg_ref, fb_ref,       # (1, H) CompositeModel.output_layer_norm
    seg_ref,        # (A, nh)     f32   head-membership one-hot
    seg_t_ref,      # (nh, A)     f32
    alpha_ref,      # (1,)        f32   SMEM scalar
    out_ref,        # (Bt, H)     -> output[:, 0, :]
):
    Bt, S, H = sql_ref.shape
    A, nh, hs = ALL_HEAD, NUM_HEADS, HEAD_SIZE
    inv_sqrt_hs = 1.0 / sqrt(float(hs))

    # ---- per-block loads (weights are resident; DMAs amortized by pipeline) --
    wq = wq_ref[...]
    wkv = wkv_ref[...]
    wo = wo_ref[...]
    bo = bo_ref[...]
    sa_g, sa_b = sa_g_ref[...], sa_b_ref[...]
    ol_g, ol_b = ol_g_ref[...], ol_b_ref[...]
    fg, fb = fg_ref[...], fb_ref[...]
    seg, seg_t = seg_ref[...], seg_t_ref[...]
    alpha = alpha_ref[0]                                  # scalar from SMEM

    sbert = sbert_ref[...]                                # (Bt, S, H) f32
    mask = mask_ref[...]                                  # (Bt, S)    f32
    hidden = sql_ref[...]                                 # (Bt, S, H) bf16

    # CLS-row (s = 0) views — the only sentence rows the output consumes.
    mask0 = mask[:, 0:1] == 0.0                           # (Bt, 1) True = pad
    sbert0 = sbert[:, 0, :]                               # (Bt, H)
    sbert_before0 = jnp.where(mask0, 0.0, sbert0)         # (Bt, H)

    # Full-sequence layers are only required when N_LAYERS > 1.
    if N_LAYERS > 1:
        mask_b = mask == 0.0                              # (Bt, S)
        sbert_before = jnp.where(mask_b[..., None], 0.0, sbert)
        for _ in range(N_LAYERS - 1):
            hidden = _cross_layer_full(hidden, sbert_before, mask_b,
                                       wq, wkv, wo, bo,
                                       sa_g, sa_b, ol_g, ol_b)

    # ---- last cross layer: CLS query row only, bf16 MXU / f32 accumulate ----
    q0 = jnp.dot(sbert_before0.astype(jnp.bfloat16), wq,
                 preferred_element_type=jnp.float32)                 # (Bt, A)

    kvp = jnp.dot(hidden.reshape(Bt * S, H).astype(jnp.bfloat16), wkv,
                  preferred_element_type=jnp.float32)                # (Bt*S, 2A)
    k = kvp[:, :A].reshape(Bt, S, A)
    v = kvp[:, A:].reshape(Bt, S, A)

    # scores[b, j, n] = sum_{a in head n} q0[b, a] * k[b, j, a]
    prod = q0[:, None, :] * k                                        # (Bt, S, A)
    scores = jnp.dot(prod.reshape(Bt * S, A), seg,
                     preferred_element_type=jnp.float32).reshape(Bt, S, nh)

    # PyTorch masks along the query axis: if CLS row is padded, mask all keys.
    scores = jnp.where(mask0[:, :, None], -1.0e9, scores)            # f32 fill
    scaled = scores * inv_sqrt_hs
    scaled = scaled - jnp.max(scaled, axis=1, keepdims=True)         # over keys
    e = jnp.exp(scaled)
    w = e * pl.reciprocal(jnp.sum(e, axis=1, keepdims=True), approx=True)

    # Broadcast per-head weights back onto their 16 lanes, contract over keys.
    wl = jnp.dot(w.reshape(Bt * S, nh), seg_t,
                 preferred_element_type=jnp.float32).reshape(Bt, S, A)
    attn0 = jnp.sum(wl * v, axis=1)                                  # (Bt, A)

    # Residual + sa_layer_norm, output projection + residual + output LN.
    attn0 = _layernorm(attn0 + sbert_before0, sa_g, sa_b)            # (Bt, H)
    out0 = jnp.dot(attn0.astype(jnp.bfloat16), wo,
                   preferred_element_type=jnp.float32) + bo
    hidden0 = _layernorm(out0 + attn0, ol_g, ol_b)                   # (Bt, H)

    # (sbert - sbert_before) + alpha * masked_fill(hidden) collapses to one
    # select at row 0: masked -> sbert row, unmasked -> alpha * hidden row.
    combined = jnp.where(mask0, sbert0, alpha * hidden0)             # (Bt, H)
    out_ref[...] = _layernorm(combined, fg, fb).astype(out_ref.dtype)


# -------------------------- one-time param prep -------------------------------
def prepare_params(p):
    """Fuse wk|wv, cast MXU weights to bf16, build segment matrices, reshape
    1-D vectors to lane-dense (1, H).  Call once at setup, not per forward."""
    H, A, nh, hs = HIDDEN, ALL_HEAD, NUM_HEADS, HEAD_SIZE
    wkv = jnp.concatenate([p["wk"], p["wv"]], axis=1)                 # (H, 2A)
    a_idx = jnp.arange(A, dtype=jnp.int32)[:, None]
    n_idx = jnp.arange(nh, dtype=jnp.int32)[None, :]
    seg = (a_idx // hs == n_idx).astype(jnp.float32)                  # (A, nh)
    seg_t = jnp.transpose(seg)                                        # (nh, A)

    def row(v):
        return v.reshape(1, H).astype(jnp.float32)

    return {
        "wq": p["wq"].astype(jnp.bfloat16),
        "wkv": wkv.astype(jnp.bfloat16),
        "wo": p["wo"].astype(jnp.bfloat16),
        "bo": row(p["bo"]),
        "sa_g": row(p["sa_g"]), "sa_b": row(p["sa_b"]),
        "ol_g": row(p["ol_g"]), "ol_b": row(p["ol_b"]),
        "fg": row(p["fg"]), "fb": row(p["fb"]),
        "seg": seg, "seg_t": seg_t,
        "alpha": p["alpha"].reshape(1).astype(jnp.float32),           # SMEM
    }


# ------------------------------ wrapper ---------------------------------------
def composite_forward(sbert_out, sql_out, sentence_mask, kp, *, b_tile=B_TILE):
    B, S, H = sbert_out.shape
    A, nh = ALL_HEAD, NUM_HEADS

    # Pad batch to a multiple of b_tile (padded rows are fully masked -> inert).
    pad_b = (-B) % b_tile
    if pad_b:
        sbert_out = jnp.pad(sbert_out, ((0, pad_b), (0, 0), (0, 0)))
        sql_out = jnp.pad(sql_out, ((0, pad_b), (0, 0), (0, 0)))
        sentence_mask = jnp.pad(sentence_mask, ((0, pad_b), (0, 0)))
    pb = B + pad_b

    # K/V source shipped as bf16: halves activation HBM/VMEM traffic.
    sql_bf16 = sql_out.astype(jnp.bfloat16)
    sentence_mask = sentence_mask.astype(jnp.float32)

    def act3():
        return pl.BlockSpec((b_tile, S, H), lambda b: (b, 0, 0))

    def resident(shape):
        return pl.BlockSpec(shape, lambda b: (0,) * len(shape))

    in_specs = [
        act3(),                                            # sbert
        act3(),                                            # sql (bf16)
        pl.BlockSpec((b_tile, S), lambda b: (b, 0)),       # mask
        resident((H, A)),                                  # wq
        resident((H, 2 * A)),                              # wkv
        resident((A, H)),                                  # wo
        resident((1, H)),                                  # bo
        resident((1, H)), resident((1, H)),                # sa_g, sa_b
        resident((1, H)), resident((1, H)),                # ol_g, ol_b
        resident((1, H)), resident((1, H)),                # fg, fb
        resident((A, nh)),                                 # seg
        resident((nh, A)),                                 # seg_t
        pl.BlockSpec(memory_space=pltpu.MemorySpace.SMEM), # alpha scalar
    ]
    out_spec = pl.BlockSpec((b_tile, H), lambda b: (b, 0))

    out = pl.pallas_call(
        composite_kernel,
        out_shape=jax.ShapeDtypeStruct((pb, H), jnp.float32),
        grid=(pb // b_tile,),
        in_specs=in_specs,
        out_specs=out_spec,
        compiler_params=pltpu.CompilerParams(
            # Batch axis is independent -> megacore / 2-TC split on v7x.
            dimension_semantics=("parallel",),
            # 48 MiB fits v7x's 64 MiB/TC; raise toward ~100 MiB only on
            # v5e/v6e when scaling block sizes to production shapes.
            vmem_limit_bytes=48 * 1024 * 1024,
        ),
    )(sbert_out, sql_bf16, sentence_mask,
      kp["wq"], kp["wkv"], kp["wo"], kp["bo"],
      kp["sa_g"], kp["sa_b"], kp["ol_g"], kp["ol_b"],
      kp["fg"], kp["fb"], kp["seg"], kp["seg_t"], kp["alpha"])
    return out[:B]


# --------------------------- pure-JAX reference --------------------------------
def composite_reference(sbert, sql, mask, p):
    B, S, H = sbert.shape
    nh, hs = NUM_HEADS, HEAD_SIZE
    mask_before = (mask == 0.0)
    sbert_before = jnp.where(mask_before[..., None], 0.0, sbert)
    hidden = sql
    for _ in range(N_LAYERS):
        q = (sbert_before @ p["wq"]).reshape(B, S, nh, hs)
        k = (hidden @ p["wk"]).reshape(B, S, nh, hs)
        v = (hidden @ p["wv"]).reshape(B, S, nh, hs)
        scores = jnp.einsum("bqnh,bknh->bnqk", q, k)
        scores = jnp.where(mask_before[:, None, :, None], -1.0e9, scores)
        weights = jax.nn.softmax(scores / sqrt(float(hs)), axis=-1)
        attn = jnp.einsum("bnqk,bknh->bqnh", weights, v).reshape(B, S, nh * hs)
        attn = _layernorm(attn + sbert_before, p["sa_g"], p["sa_b"])
        out = attn @ p["wo"] + p["bo"] + attn
        hidden = _layernorm(out, p["ol_g"], p["ol_b"])
    output = jnp.where(mask_before[..., None], 0.0, hidden)
    final = _layernorm(sbert - sbert_before + p["alpha"][0, 0] * output,
                       p["fg"], p["fb"])
    return final[:, 0, :]


# --------------------------------- main ----------------------------------------
if __name__ == "__main__":
    key = jax.random.PRNGKey(0)
    keys = jax.random.split(key, 10)

    B, S, H, A = BATCH, SEQ, HIDDEN, ALL_HEAD

    # "Backbone" hidden states (stand-ins for DistilBERT last_hidden_state).
    sbert_out = jax.random.normal(keys[0], (B, S, H), dtype=jnp.float32)
    sql_out = jax.random.normal(keys[1], (B, S, H), dtype=jnp.float32)

    # sentence_mask: ones up to (exclusive) the SEP position, zeros after —
    # computed as plain-JAX glue (SEP scan over input_ids not done in-kernel).
    sep_positions = jnp.array([5, 3], dtype=jnp.int32)
    sentence_mask = (jnp.arange(S)[None, :] < sep_positions[:, None]).astype(jnp.float32)

    scale = 0.05
    params = {
        "wq": scale * jax.random.normal(keys[2], (H, A), dtype=jnp.float32),
        "wk": scale * jax.random.normal(keys[3], (H, A), dtype=jnp.float32),
        "wv": scale * jax.random.normal(keys[4], (H, A), dtype=jnp.float32),
        "wo": scale * jax.random.normal(keys[5], (A, H), dtype=jnp.float32),
        "bo": scale * jax.random.normal(keys[6], (H,), dtype=jnp.float32),
        "sa_g": jnp.ones((H,), jnp.float32),
        "sa_b": jnp.zeros((H,), jnp.float32),
        "ol_g": jnp.ones((H,), jnp.float32),
        "ol_b": jnp.zeros((H,), jnp.float32),
        "fg": jnp.ones((H,), jnp.float32),
        "fb": jnp.zeros((H,), jnp.float32),
        "alpha": jnp.ones((1, 1), jnp.float32),  # nn.Parameter(torch.tensor(1.0))
    }

    kernel_params = prepare_params(params)       # one-time weight prep

    out = composite_forward(sbert_out, sql_out, sentence_mask, kernel_params)
    out = jax.block_until_ready(out)

    ref = composite_reference(sbert_out, sql_out, sentence_mask, params)
    assert out.shape == (B, H)
    max_err = float(jnp.max(jnp.abs(out - ref)))
    # bf16 MXU inputs / f32 accumulation vs. pure-f32 reference.
    assert jnp.allclose(out, ref, rtol=3e-2, atol=3e-2), (
        f"mismatch vs reference, max abs err = {max_err}")

    print("KERNEL_OK")
</pallas_src>

<mosaic_0001>
module attributes {stable_mosaic.version = 11 : i64} {
  func.func @composite_kernel(%arg0: i32, %arg1: memref<8x8x128xf32, #tpu.memory_space<vmem>>, %arg2: memref<8x8x128xbf16, #tpu.memory_space<vmem>>, %arg3: memref<8x8xf32, #tpu.memory_space<vmem>>, %arg4: memref<128x128xbf16, #tpu.memory_space<vmem>>, %arg5: memref<128x256xbf16, #tpu.memory_space<vmem>>, %arg6: memref<128x128xbf16, #tpu.memory_space<vmem>>, %arg7: memref<1x128xf32, #tpu.memory_space<vmem>>, %arg8: memref<1x128xf32, #tpu.memory_space<vmem>>, %arg9: memref<1x128xf32, #tpu.memory_space<vmem>>, %arg10: memref<1x128xf32, #tpu.memory_space<vmem>>, %arg11: memref<1x128xf32, #tpu.memory_space<vmem>>, %arg12: memref<1x128xf32, #tpu.memory_space<vmem>>, %arg13: memref<1x128xf32, #tpu.memory_space<vmem>>, %arg14: memref<128x8xf32, #tpu.memory_space<vmem>>, %arg15: memref<8x128xf32, #tpu.memory_space<vmem>>, %arg16: memref<1xf32, #tpu.memory_space<smem>>, %arg17: memref<8x128xf32, #tpu.memory_space<vmem>>) attributes {dimension_semantics = [#tpu.dimension_semantics<parallel>], iteration_bounds = array<i64: 1>, scalar_prefetch = 0 : i64, scratch_operands = 0 : i64, tpu.core_type = #tpu.core_type<tc>, window_params = [{transform_indices = @transform_0, window_bounds = array<i64: 8, 8, 128>}, {transform_indices = @transform_1, window_bounds = array<i64: 8, 8, 128>}, {transform_indices = @transform_2, window_bounds = array<i64: 8, 8>}, {pipeline_mode = #tpu.pipeline_mode<synchronous>, transform_indices = @transform_3, window_bounds = array<i64: 128, 128>}, {pipeline_mode = #tpu.pipeline_mode<synchronous>, transform_indices = @transform_4, window_bounds = array<i64: 128, 256>}, {pipeline_mode = #tpu.pipeline_mode<synchronous>, transform_indices = @transform_5, window_bounds = array<i64: 128, 128>}, {pipeline_mode = #tpu.pipeline_mode<synchronous>, transform_indices = @transform_6, window_bounds = array<i64: 1, 128>}, {pipeline_mode = #tpu.pipeline_mode<synchronous>, transform_indices = @transform_7, window_bounds = array<i64: 1, 128>}, {pipeline_mode = #tpu.pipeline_mode<synchronous>, transform_indices = @transform_8, window_bounds = array<i64: 1, 128>}, {pipeline_mode = #tpu.pipeline_mode<synchronous>, transform_indices = @transform_9, window_bounds = array<i64: 1, 128>}, {pipeline_mode = #tpu.pipeline_mode<synchronous>, transform_indices = @transform_10, window_bounds = array<i64: 1, 128>}, {pipeline_mode = #tpu.pipeline_mode<synchronous>, transform_indices = @transform_11, window_bounds = array<i64: 1, 128>}, {pipeline_mode = #tpu.pipeline_mode<synchronous>, transform_indices = @transform_12, window_bounds = array<i64: 1, 128>}, {pipeline_mode = #tpu.pipeline_mode<synchronous>, transform_indices = @transform_13, window_bounds = array<i64: 128, 8>}, {pipeline_mode = #tpu.pipeline_mode<synchronous>, transform_indices = @transform_14, window_bounds = array<i64: 8, 128>}, {transform_indices = @transform_15, window_bounds = array<i64: 1>}, {transform_indices = @transform_16, window_bounds = array<i64: 8, 128>}]} {
    %c0 = arith.constant 0 : index
    %c0_0 = arith.constant 0 : index
    %0 = vector.load %arg4[%c0, %c0_0] : memref<128x128xbf16, #tpu.memory_space<vmem>>, vector<128x128xbf16>
    %c0_1 = arith.constant 0 : index
    %c0_2 = arith.constant 0 : index
    %1 = vector.load %arg5[%c0_1, %c0_2] : memref<128x256xbf16, #tpu.memory_space<vmem>>, vector<128x256xbf16>
    %c0_3 = arith.constant 0 : index
    %c0_4 = arith.constant 0 : index
    %2 = vector.load %arg6[%c0_3, %c0_4] : memref<128x128xbf16, #tpu.memory_space<vmem>>, vector<128x128xbf16>
    %c0_5 = arith.constant 0 : index
    %c0_6 = arith.constant 0 : index
    %3 = vector.load %arg7[%c0_5, %c0_6] : memref<1x128xf32, #tpu.memory_space<vmem>>, vector<1x128xf32>
    %c0_7 = arith.constant 0 : index
    %c0_8 = arith.constant 0 : index
    %4 = vector.load %arg8[%c0_7, %c0_8] : memref<1x128xf32, #tpu.memory_space<vmem>>, vector<1x128xf32>
    %c0_9 = arith.constant 0 : index
    %c0_10 = arith.constant 0 : index
    %5 = vector.load %arg9[%c0_9, %c0_10] : memref<1x128xf32, #tpu.memory_space<vmem>>, vector<1x128xf32>
    %c0_11 = arith.constant 0 : index
    %c0_12 = arith.constant 0 : index
    %6 = vector.load %arg10[%c0_11, %c0_12] : memref<1x128xf32, #tpu.memory_space<vmem>>, vector<1x128xf32>
    %c0_13 = arith.constant 0 : index
    %c0_14 = arith.constant 0 : index
    %7 = vector.load %arg11[%c0_13, %c0_14] : memref<1x128xf32, #tpu.memory_space<vmem>>, vector<1x128xf32>
    %c0_15 = arith.constant 0 : index
    %c0_16 = arith.constant 0 : index
    %8 = vector.load %arg12[%c0_15, %c0_16] : memref<1x128xf32, #tpu.memory_space<vmem>>, vector<1x128xf32>
    %c0_17 = arith.constant 0 : index
    %c0_18 = arith.constant 0 : index
    %9 = vector.load %arg13[%c0_17, %c0_18] : memref<1x128xf32, #tpu.memory_space<vmem>>, vector<1x128xf32>
    %c0_19 = arith.constant 0 : index
    %c0_20 = arith.constant 0 : index
    %10 = vector.load %arg14[%c0_19, %c0_20] : memref<128x8xf32, #tpu.memory_space<vmem>>, vector<128x8xf32>
    %c0_21 = arith.constant 0 : index
    %c0_22 = arith.constant 0 : index
    %11 = vector.load %arg15[%c0_21, %c0_22] : memref<8x128xf32, #tpu.memory_space<vmem>>, vector<8x128xf32>
    %c0_23 = arith.constant 0 : index
    %12 = memref.load %arg16[%c0_23] : memref<1xf32, #tpu.memory_space<smem>>
    %c0_24 = arith.constant 0 : index
    %c0_25 = arith.constant 0 : index
    %c0_26 = arith.constant 0 : index
    %13 = vector.load %arg1[%c0_24, %c0_25, %c0_26] : memref<8x8x128xf32, #tpu.memory_space<vmem>>, vector<8x8x128xf32>
    %c0_27 = arith.constant 0 : index
    %c0_28 = arith.constant 0 : index
    %14 = vector.load %arg3[%c0_27, %c0_28] : memref<8x8xf32, #tpu.memory_space<vmem>>, vector<8x8xf32>
    %c0_29 = arith.constant 0 : index
    %c0_30 = arith.constant 0 : index
    %c0_31 = arith.constant 0 : index
    %15 = vector.load %arg2[%c0_29, %c0_30, %c0_31] : memref<8x8x128xbf16, #tpu.memory_space<vmem>>, vector<8x8x128xbf16>
    %16 = vector.extract_strided_slice %14 {offsets = [0, 0], sizes = [8, 1], strides = [1, 1]} : vector<8x8xf32> to vector<8x1xf32>
    %cst = arith.constant 0.000000e+00 : f32
    %17 = vector.broadcast %cst : f32 to vector<8x1xf32>
    %18 = arith.cmpf oeq, %16, %17 : vector<8x1xf32>
    %19 = vector.extract_strided_slice %13 {offsets = [0, 0, 0], sizes = [8, 1, 128], strides = [1, 1, 1]} : vector<8x8x128xf32> to vector<8x1x128xf32>
    %20 = vector.shape_cast %19 : vector<8x1x128xf32> to vector<8x128xf32>
    %cst_32 = arith.constant 0.000000e+00 : f32
    %21 = vector.shape_cast %18 : vector<8x1xi1> to vector<8x1xi1>
    %22 = vector.broadcast %21 : vector<8x1xi1> to vector<8x128xi1>
    %23 = vector.broadcast %cst_32 : f32 to vector<8x128xf32>
    %24 = arith.select %22, %23, %20 : vector<8x128xi1>, vector<8x128xf32>
    %25 = arith.truncf %24 : vector<8x128xf32> to vector<8x128xbf16>
    %cst_33 = arith.constant dense<0.000000e+00> : vector<8x128xf32>
    %26 = tpu.matmul %25, %0, %cst_33 {dimension_numbers = #tpu.dot_dimension_numbers<[1], [0], [0], [1], [0, 0, 1, 1], [], []>} : vector<8x128xbf16>, vector<128x128xbf16>, vector<8x128xf32> -> vector<8x128xf32>
    %27 = vector.shape_cast %15 : vector<8x8x128xbf16> to vector<64x128xbf16>
    %cst_34 = arith.constant dense<0.000000e+00> : vector<64x256xf32>
    %28 = tpu.matmul %27, %1, %cst_34 {dimension_numbers = #tpu.dot_dimension_numbers<[1], [0], [0], [1], [0, 0, 1, 1], [], []>} : vector<64x128xbf16>, vector<128x256xbf16>, vector<64x256xf32> -> vector<64x256xf32>
    %29 = vector.extract_strided_slice %28 {offsets = [0, 0], sizes = [64, 128], strides = [1, 1]} : vector<64x256xf32> to vector<64x128xf32>
    %30 = vector.shape_cast %29 : vector<64x128xf32> to vector<8x8x128xf32>
    %31 = vector.extract_strided_slice %28 {offsets = [0, 128], sizes = [64, 128], strides = [1, 1]} : vector<64x256xf32> to vector<64x128xf32>
    %32 = vector.shape_cast %31 : vector<64x128xf32> to vector<8x8x128xf32>
    %33 = vector.shape_cast %26 : vector<8x128xf32> to vector<8x1x128xf32>
    %34 = vector.broadcast %33 : vector<8x1x128xf32> to vector<8x8x128xf32>
    %35 = arith.mulf %34, %30 : vector<8x8x128xf32>
    %36 = vector.shape_cast %35 : vector<8x8x128xf32> to vector<64x128xf32>
    %cst_35 = arith.constant dense<0.000000e+00> : vector<64x8xf32>
    %37 = tpu.matmul %36, %10, %cst_35 {dimension_numbers = #tpu.dot_dimension_numbers<[1], [0], [0], [1], [0, 0, 1, 1], [], []>} : vector<64x128xf32>, vector<128x8xf32>, vector<64x8xf32> -> vector<64x8xf32>
    %38 = vector.shape_cast %37 : vector<64x8xf32> to vector<8x8x8xf32>
    %39 = vector.shape_cast %18 : vector<8x1xi1> to vector<8x1x1xi1>
    %cst_36 = arith.constant -1.000000e+09 : f32
    %40 = vector.shape_cast %39 : vector<8x1x1xi1> to vector<8x1x1xi1>
    %41 = vector.broadcast %40 : vector<8x1x1xi1> to vector<8x8x8xi1>
    %42 = vector.broadcast %cst_36 : f32 to vector<8x8x8xf32>
    %43 = arith.select %41, %42, %38 : vector<8x8x8xi1>, vector<8x8x8xf32>
    %cst_37 = arith.constant 2.500000e-01 : f32
    %44 = vector.broadcast %cst_37 : f32 to vector<8x8x8xf32>
    %45 = arith.mulf %43, %44 : vector<8x8x8xf32>
    %cst_38 = arith.constant dense<0xFF800000> : vector<8x8xf32>
    %46 = vector.multi_reduction <maximumf>, %45, %cst_38 [1] : vector<8x8x8xf32> to vector<8x8xf32>
    %47 = vector.shape_cast %46 : vector<8x8xf32> to vector<8x1x8xf32>
    %48 = vector.broadcast %47 : vector<8x1x8xf32> to vector<8x8x8xf32>
    %49 = arith.subf %45, %48 : vector<8x8x8xf32>
    %50 = math.exp %49 : vector<8x8x8xf32>
    %cst_39 = arith.constant dense<0.000000e+00> : vector<8x8xf32>
    %51 = vector.multi_reduction <add>, %50, %cst_39 [1] : vector<8x8x8xf32> to vector<8x8xf32>
    %52 = vector.shape_cast %51 : vector<8x8xf32> to vector<8x1x8xf32>
    %53 = tpu.reciprocal %52 {approx = true} : vector<8x1x8xf32> -> vector<8x1x8xf32>
    %54 = vector.broadcast %53 : vector<8x1x8xf32> to vector<8x8x8xf32>
    %55 = arith.mulf %50, %54 : vector<8x8x8xf32>
    %56 = vector.shape_cast %55 : vector<8x8x8xf32> to vector<64x8xf32>
    %cst_40 = arith.constant dense<0.000000e+00> : vector<64x128xf32>
    %57 = tpu.matmul %56, %11, %cst_40 {dimension_numbers = #tpu.dot_dimension_numbers<[1], [0], [0], [1], [0, 0, 1, 1], [], []>} : vector<64x8xf32>, vector<8x128xf32>, vector<64x128xf32> -> vector<64x128xf32>
    %58 = vector.shape_cast %57 : vector<64x128xf32> to vector<8x8x128xf32>
    %59 = arith.mulf %58, %32 : vector<8x8x128xf32>
    %cst_41 = arith.constant dense<0.000000e+00> : vector<8x128xf32>
    %60 = vector.multi_reduction <add>, %59, %cst_41 [1] : vector<8x8x128xf32> to vector<8x128xf32>
    %61 = arith.addf %60, %24 : vector<8x128xf32>
    %cst_42 = arith.constant dense<0.000000e+00> : vector<8xf32>
    %62 = vector.multi_reduction <add>, %61, %cst_42 [1] : vector<8x128xf32> to vector<8xf32>
    %63 = vector.shape_cast %62 : vector<8xf32> to vector<8x1xf32>
    %cst_43 = arith.constant 1.280000e+02 : f32
    %64 = vector.broadcast %cst_43 : f32 to vector<8x1xf32>
    %65 = arith.divf %63, %64 : vector<8x1xf32>
    %66 = vector.broadcast %65 : vector<8x1xf32> to vector<8x128xf32>
    %67 = arith.subf %61, %66 : vector<8x128xf32>
    %68 = arith.mulf %67, %67 : vector<8x128xf32>
    %cst_44 = arith.constant dense<0.000000e+00> : vector<8xf32>
    %69 = vector.multi_reduction <add>, %68, %cst_44 [1] : vector<8x128xf32> to vector<8xf32>
    %70 = vector.shape_cast %69 : vector<8xf32> to vector<8x1xf32>
    %cst_45 = arith.constant 1.280000e+02 : f32
    %71 = vector.broadcast %cst_45 : f32 to vector<8x1xf32>
    %72 = arith.divf %70, %71 : vector<8x1xf32>
    %73 = vector.broadcast %65 : vector<8x1xf32> to vector<8x128xf32>
    %74 = arith.subf %61, %73 : vector<8x128xf32>
    %cst_46 = arith.constant 9.99999996E-13 : f32
    %75 = vector.broadcast %cst_46 : f32 to vector<8x1xf32>
    %76 = arith.addf %72, %75 : vector<8x1xf32>
    %77 = math.rsqrt %76 : vector<8x1xf32>
    %78 = vector.broadcast %77 : vector<8x1xf32> to vector<8x128xf32>
    %79 = arith.mulf %74, %78 : vector<8x128xf32>
    %80 = vector.broadcast %4 : vector<1x128xf32> to vector<8x128xf32>
    %81 = arith.mulf %79, %80 : vector<8x128xf32>
    %82 = vector.broadcast %5 : vector<1x128xf32> to vector<8x128xf32>
    %83 = arith.addf %81, %82 : vector<8x128xf32>
    %84 = arith.truncf %83 : vector<8x128xf32> to vector<8x128xbf16>
    %cst_47 = arith.constant dense<0.000000e+00> : vector<8x128xf32>
    %85 = tpu.matmul %84, %2, %cst_47 {dimension_numbers = #tpu.dot_dimension_numbers<[1], [0], [0], [1], [0, 0, 1, 1], [], []>} : vector<8x128xbf16>, vector<128x128xbf16>, vector<8x128xf32> -> vector<8x128xf32>
    %86 = vector.broadcast %3 : vector<1x128xf32> to vector<8x128xf32>
    %87 = arith.addf %85, %86 : vector<8x128xf32>
    %88 = arith.addf %87, %83 : vector<8x128xf32>
    %cst_48 = arith.constant dense<0.000000e+00> : vector<8xf32>
    %89 = vector.multi_reduction <add>, %88, %cst_48 [1] : vector<8x128xf32> to vector<8xf32>
    %90 = vector.shape_cast %89 : vector<8xf32> to vector<8x1xf32>
    %cst_49 = arith.constant 1.280000e+02 : f32
    %91 = vector.broadcast %cst_49 : f32 to vector<8x1xf32>
    %92 = arith.divf %90, %91 : vector<8x1xf32>
    %93 = vector.broadcast %92 : vector<8x1xf32> to vector<8x128xf32>
    %94 = arith.subf %88, %93 : vector<8x128xf32>
    %95 = arith.mulf %94, %94 : vector<8x128xf32>
    %cst_50 = arith.constant dense<0.000000e+00> : vector<8xf32>
    %96 = vector.multi_reduction <add>, %95, %cst_50 [1] : vector<8x128xf32> to vector<8xf32>
    %97 = vector.shape_cast %96 : vector<8xf32> to vector<8x1xf32>
    %cst_51 = arith.constant 1.280000e+02 : f32
    %98 = vector.broadcast %cst_51 : f32 to vector<8x1xf32>
    %99 = arith.divf %97, %98 : vector<8x1xf32>
    %100 = vector.broadcast %92 : vector<8x1xf32> to vector<8x128xf32>
    %101 = arith.subf %88, %100 : vector<8x128xf32>
    %cst_52 = arith.constant 9.99999996E-13 : f32
    %102 = vector.broadcast %cst_52 : f32 to vector<8x1xf32>
    %103 = arith.addf %99, %102 : vector<8x1xf32>
    %104 = math.rsqrt %103 : vector<8x1xf32>
    %105 = vector.broadcast %104 : vector<8x1xf32> to vector<8x128xf32>
    %106 = arith.mulf %101, %105 : vector<8x128xf32>
    %107 = vector.broadcast %6 : vector<1x128xf32> to vector<8x128xf32>
    %108 = arith.mulf %106, %107 : vector<8x128xf32>
    %109 = vector.broadcast %7 : vector<1x128xf32> to vector<8x128xf32>
    %110 = arith.addf %108, %109 : vector<8x128xf32>
    %111 = vector.broadcast %12 : f32 to vector<8x128xf32>
    %112 = arith.mulf %111, %110 : vector<8x128xf32>
    %113 = vector.shape_cast %18 : vector<8x1xi1> to vector<8x1xi1>
    %114 = vector.broadcast %113 : vector<8x1xi1> to vector<8x128xi1>
    %115 = arith.select %114, %20, %112 : vector<8x128xi1>, vector<8x128xf32>
    %cst_53 = arith.constant dense<0.000000e+00> : vector<8xf32>
    %116 = vector.multi_reduction <add>, %115, %cst_53 [1] : vector<8x128xf32> to vector<8xf32>
    %117 = vector.shape_cast %116 : vector<8xf32> to vector<8x1xf32>
    %cst_54 = arith.constant 1.280000e+02 : f32
    %118 = vector.broadcast %cst_54 : f32 to vector<8x1xf32>
    %119 = arith.divf %117, %118 : vector<8x1xf32>
    %120 = vector.broadcast %119 : vector<8x1xf32> to vector<8x128xf32>
    %121 = arith.subf %115, %120 : vector<8x128xf32>
    %122 = arith.mulf %121, %121 : vector<8x128xf32>
    %cst_55 = arith.constant dense<0.000000e+00> : vector<8xf32>
    %123 = vector.multi_reduction <add>, %122, %cst_55 [1] : vector<8x128xf32> to vector<8xf32>
    %124 = vector.shape_cast %123 : vector<8xf32> to vector<8x1xf32>
    %cst_56 = arith.constant 1.280000e+02 : f32
    %125 = vector.broadcast %cst_56 : f32 to vector<8x1xf32>
    %126 = arith.divf %124, %125 : vector<8x1xf32>
    %127 = vector.broadcast %119 : vector<8x1xf32> to vector<8x128xf32>
    %128 = arith.subf %115, %127 : vector<8x128xf32>
    %cst_57 = arith.constant 9.99999996E-13 : f32
    %129 = vector.broadcast %cst_57 : f32 to vector<8x1xf32>
    %130 = arith.addf %126, %129 : vector<8x1xf32>
    %131 = math.rsqrt %130 : vector<8x1xf32>
    %132 = vector.broadcast %131 : vector<8x1xf32> to vector<8x128xf32>
    %133 = arith.mulf %128, %132 : vector<8x128xf32>
    %134 = vector.broadcast %8 : vector<1x128xf32> to vector<8x128xf32>
    %135 = arith.mulf %133, %134 : vector<8x128xf32>
    %136 = vector.broadcast %9 : vector<1x128xf32> to vector<8x128xf32>
    %137 = arith.addf %135, %136 : vector<8x128xf32>
    %c0_58 = arith.constant 0 : index
    %c0_59 = arith.constant 0 : index
    %138 = vector.load %arg17[%c0_58, %c0_59] : memref<8x128xf32, #tpu.memory_space<vmem>>, vector<8x128xf32>
    tpu.vector_store %arg17[%c0_58, %c0_59], %137 {strides = array<i32>} : memref<8x128xf32, #tpu.memory_space<vmem>>, vector<8x128xf32>,
    return
  }
  func.func @transform_0(%arg0: i32) -> (i32, i32, i32) {
    %c0_i32 = arith.constant 0 : i32
    %c0_i32_0 = arith.constant 0 : i32
    %c0_i32_1 = arith.constant 0 : i32
    return %arg0, %c0_i32, %c0_i32_0 : i32, i32, i32
  }
  func.func @transform_1(%arg0: i32) -> (i32, i32, i32) {
    %c0_i32 = arith.constant 0 : i32
    %c0_i32_0 = arith.constant 0 : i32
    %c0_i32_1 = arith.constant 0 : i32
    return %arg0, %c0_i32, %c0_i32_0 : i32, i32, i32
  }
  func.func @transform_2(%arg0: i32) -> (i32, i32) {
    %c0_i32 = arith.constant 0 : i32
    %c0_i32_0 = arith.constant 0 : i32
    return %arg0, %c0_i32 : i32, i32
  }
  func.func @transform_3(%arg0: i32) -> (i32, i32) {
    %c0_i32 = arith.constant 0 : i32
    %c0_i32_0 = arith.constant 0 : i32
    %c0_i32_1 = arith.constant 0 : i32
    return %c0_i32, %c0_i32_0 : i32, i32
  }
  func.func @transform_4(%arg0: i32) -> (i32, i32) {
    %c0_i32 = arith.constant 0 : i32
    %c0_i32_0 = arith.constant 0 : i32
    %c0_i32_1 = arith.constant 0 : i32
    return %c0_i32, %c0_i32_0 : i32, i32
  }
  func.func @transform_5(%arg0: i32) -> (i32, i32) {
    %c0_i32 = arith.constant 0 : i32
    %c0_i32_0 = arith.constant 0 : i32
    %c0_i32_1 = arith.constant 0 : i32
    return %c0_i32, %c0_i32_0 : i32, i32
  }
  func.func @transform_6(%arg0: i32) -> (i32, i32) {
    %c0_i32 = arith.constant 0 : i32
    %c0_i32_0 = arith.constant 0 : i32
    %c0_i32_1 = arith.constant 0 : i32
    return %c0_i32, %c0_i32_0 : i32, i32
  }
  func.func @transform_7(%arg0: i32) -> (i32, i32) {
    %c0_i32 = arith.constant 0 : i32
    %c0_i32_0 = arith.constant 0 : i32
    %c0_i32_1 = arith.constant 0 : i32
    return %c0_i32, %c0_i32_0 : i32, i32
  }
  func.func @transform_8(%arg0: i32) -> (i32, i32) {
    %c0_i32 = arith.constant 0 : i32
    %c0_i32_0 = arith.constant 0 : i32
    %c0_i32_1 = arith.constant 0 : i32
    return %c0_i32, %c0_i32_0 : i32, i32
  }
  func.func @transform_9(%arg0: i32) -> (i32, i32) {
    %c0_i32 = arith.constant 0 : i32
    %c0_i32_0 = arith.constant 0 : i32
    %c0_i32_1 = arith.constant 0 : i32
    return %c0_i32, %c0_i32_0 : i32, i32
  }
  func.func @transform_10(%arg0: i32) -> (i32, i32) {
    %c0_i32 = arith.constant 0 : i32
    %c0_i32_0 = arith.constant 0 : i32
    %c0_i32_1 = arith.constant 0 : i32
    return %c0_i32, %c0_i32_0 : i32, i32
  }
  func.func @transform_11(%arg0: i32) -> (i32, i32) {
    %c0_i32 = arith.constant 0 : i32
    %c0_i32_0 = arith.constant 0 : i32
    %c0_i32_1 = arith.constant 0 : i32
    return %c0_i32, %c0_i32_0 : i32, i32
  }
  func.func @transform_12(%arg0: i32) -> (i32, i32) {
    %c0_i32 = arith.constant 0 : i32
    %c0_i32_0 = arith.constant 0 : i32
    %c0_i32_1 = arith.constant 0 : i32
    return %c0_i32, %c0_i32_0 : i32, i32
  }
  func.func @transform_13(%arg0: i32) -> (i32, i32) {
    %c0_i32 = arith.constant 0 : i32
    %c0_i32_0 = arith.constant 0 : i32
    %c0_i32_1 = arith.constant 0 : i32
    return %c0_i32, %c0_i32_0 : i32, i32
  }
  func.func @transform_14(%arg0: i32) -> (i32, i32) {
    %c0_i32 = arith.constant 0 : i32
    %c0_i32_0 = arith.constant 0 : i32
    %c0_i32_1 = arith.constant 0 : i32
    return %c0_i32, %c0_i32_0 : i32, i32
  }
  func.func @transform_15(%arg0: i32) -> i32 {
    %c0_i32 = arith.constant 0 : i32
    %c0_i32_0 = arith.constant 0 : i32
    return %c0_i32 : i32
  }
  func.func @transform_16(%arg0: i32) -> (i32, i32) {
    %c0_i32 = arith.constant 0 : i32
    %c0_i32_0 = arith.constant 0 : i32
    return %arg0, %c0_i32 : i32, i32
  }
}

</mosaic_0001>

<bundles_post_ra>
// kernel: tpu_custom_call.1
= control target key start
LH: loop header
LB: loop body
LE: loop exit
PB: predicated region body
PF: predicated region fallthrough
CT: control target
= control target key end

     0   :  { %s2600_s0 = inlined_call_operand.hbm [shape: f32[8,8,128], index: 0, kind: input, shape index: {}]   ;;  %s2601_s1 = inlined_call_operand.hbm [shape: bf16[8,8,128], index: 1, kind: input, shape index: {}]   ;;  %s2602_s2 = inlined_call_operand.vmem [shape: f32[8,8], index: 2, kind: input, shape index: {}]   ;;  %s2603_s3 = inlined_call_operand.hbm [shape: bf16[128,128], index: 3, kind: input, shape index: {}]   ;;  %s2604_s4 = inlined_call_operand.vmem [shape: bf16[128,256], index: 4, kind: input, shape index: {}]   ;;  %s2605_s5 = inlined_call_operand.hbm [shape: bf16[128,128], index: 5, kind: input, shape index: {}]   ;;  %s2606_s6 = inlined_call_operand.vmem [shape: f32[1,128], index: 6, kind: input, shape index: {}]   ;;  %s2607_s7 = inlined_call_operand.vmem [shape: f32[1,128], index: 7, kind: input, shape index: {}]   ;;  %s2608_s8 = inlined_call_operand.vmem [shape: f32[1,128], index: 8, kind: input, shape index: {}]   ;;  %s2609_s9 = inlined_call_operand.vmem [shape: f32[1,128], index: 9, kind: input, shape index: {}]   ;;  %s2610_s10 = inlined_call_operand.vmem [shape: f32[1,128], index: 10, kind: input, shape index: {}]   ;;  %s2611_s11 = inlined_call_operand.vmem [shape: f32[1,128], index: 11, kind: input, shape index: {}]   ;;  %s2612_s12 = inlined_call_operand.vmem [shape: f32[1,128], index: 12, kind: input, shape index: {}]   ;;  %s2613_s13 = inlined_call_operand.vmem [shape: f32[128,8], index: 13, kind: input, shape index: {}]   ;;  %s2614_s14 = inlined_call_operand.vmem [shape: f32[8,128], index: 14, kind: input, shape index: {}]   ;;  %s2615_s15 = inlined_call_operand.<no memory space> [shape: f32[1], index: 15, kind: input, shape index: {}]   ;;  %s2616_s16 = inlined_call_operand.hbm [shape: f32[8,128], index: 16, kind: output, shape index: {}]  }
   0x1   :  { %2623 = sst [smem:[#allocation16_spill]] %s2600_s0 }
   0x2   :  { %2624 = sst [smem:[#allocation17_spill]] %s2616_s16 }
   0x3   :  { %22 = vsyncpa [#allocation4], 0 }
   0x4   :  { %23 = vsyncpa [#allocation7], 0 }
   0x5   :  { %24 = vsyncpa [#allocation10], 0 }
   0x6   :  { %25 = vsyncpa [#allocation5], 0  ;;  %s2034_s21 = smov [#allocation6]   ;;  %s1916_s25 = scalar_lea.hbm %s2601_s1, 512 }
   0x7   :  { %s43_s22 = sshll.u32 %s2034_s21, 4  ;;  %p1917_p0 = scmp.ne.s32.totalorder %s2601_s1, %s1916_s25  ;;  %s44_s22 = int_to_ptr.vmem [resolvable:$true] %s43_s22 }
   0x8   :  { %p1920_p1 = scmp.lt.u32.totalorder %s1916_s25, %s2601_s1 }
   0xa   :  { %p1922_p2 = pnand %p1920_p1, %p1917_p0 }
   0xc   :  { %1925 = shalt.err (!%p1922_p2)
}
   0xd   :  { %s1926_s30 = scalar_lea.vmem %s44_s22, 512  ;;  %p1931_p4 = scmp.lt.s32.totalorder %s44_s22, %s44_s22 }
   0xe   :  { %p1927_p3 = scmp.ne.s32.totalorder %s44_s22, %s1926_s30  ;;  %p1932_p5 = scmp.lt.s32.totalorder %s1926_s30, %s1926_s30 }
  0x10   :  { %p1933_p6 = por %p1932_p5, %p1931_p4 }
  0x12   :  { %p1934_p7 = pnand %p1933_p6, %p1927_p3 }
  0x14   :  { %1937 = shalt.err (!%p1934_p7)
}
  0x15   :  { %s2619_s0 = smov 64   ;;  %s2621_s17 = smov 4  }
  0x16   :  { %49 = dma.hbm_to_vmem [thread:$0]  %s2601_s1, 512, %s44_s22, [#allocation7], %s2619_s0, %s2619_s0, %s2621_s17  }
  0x17   :  { %s2037_s20 = smov [#allocation3]   ;;  %s2625_s25 = sld [smem:[#allocation16_spill]] }
  0x18   :  { %s31_s21 = sshll.u32 %s2037_s20, 4  ;;  %s32_s21 = int_to_ptr.vmem [resolvable:$true] %s31_s21 }
  0x1d   :  { %s1938_s26 = scalar_lea.hbm %s2625_s25, 1024 }
  0x1e   :  { %p1939_p8 = scmp.ne.s32.totalorder %s2625_s25, %s1938_s26  ;;  %p1942_p9 = scmp.lt.u32.totalorder %s1938_s26, %s2625_s25 }
  0x20   :  { %p1944_p10 = pnand %p1942_p9, %p1939_p8 }
  0x22   :  { %1947 = shalt.err (!%p1944_p10)
}
  0x23   :  { %s1948_s16 = scalar_lea.vmem %s32_s21, 1024  ;;  %p1953_p12 = scmp.lt.s32.totalorder %s32_s21, %s32_s21 }
  0x24   :  { %p1949_p11 = scmp.ne.s32.totalorder %s32_s21, %s1948_s16  ;;  %p1954_p13 = scmp.lt.s32.totalorder %s1948_s16, %s1948_s16 }
  0x26   :  { %p1955_p0 = por %p1954_p13, %p1953_p12 }
  0x28   :  { %p1956_p1 = pnand %p1955_p0, %p1949_p11 }
  0x2a   :  { %1959 = shalt.err (!%p1956_p1)
}
  0x2b   :  { %s2038_s1 = smov 128   ;;  %s2039_s22 = smov 8  }
  0x2c   :  { %37 = dma.hbm_to_vmem [thread:$0]  %s2625_s25, 1024, %s32_s21, [#allocation4], %s2038_s1, %s2038_s1, %s2039_s22  }
  0x2d   :  { %s2040_s20 = smov [#allocation8]   ;;  %s2041_s24 = smov [#allocation9]  }
  0x2e   :  { %s57_s23 = sshll.u32 %s2040_s20, 4  ;;  %s71_s27 = sshll.u32 %s2041_s24, 4  ;;  %s58_s23 = int_to_ptr.vmem [resolvable:$true] %s57_s23  ;;  %s2159_s27 = int_to_ptr.vmem [resolvable:$true] %s71_s27 }
  0x2f   :  { %s1960_s16 = scalar_lea.hbm %s2603_s3, 1024 }
  0x30   :  { %p1961_p2 = scmp.ne.s32.totalorder %s2603_s3, %s1960_s16  ;;  %p1964_p3 = scmp.lt.u32.totalorder %s1960_s16, %s2603_s3 }
  0x32   :  { %p1966_p4 = pnand %p1964_p3, %p1961_p2 }
  0x34   :  { %1969 = shalt.err (!%p1966_p4)
}
  0x35   :  { %s1970_s21 = scalar_lea.vmem %s58_s23, 1024  ;;  %p1975_p6 = scmp.lt.s32.totalorder %s58_s23, %s58_s23 }
  0x36   :  { %p1971_p5 = scmp.ne.s32.totalorder %s58_s23, %s1970_s21  ;;  %p1976_p7 = scmp.lt.s32.totalorder %s1970_s21, %s1970_s21 }
  0x38   :  { %p1977_p8 = por %p1976_p7, %p1975_p6 }
  0x3a   :  { %p1978_p9 = pnand %p1977_p8, %p1971_p5 }
  0x3c   :  { %1981 = shalt.err (!%p1978_p9)
}
  0x3d   :  { %s2626_s25 = smov 4   ;;  %s2627_s1 = smov 64  }
  0x3e   :  { %63 = dma.hbm_to_vmem [thread:$0]  %s2603_s3, 1024, %s58_s23, [#allocation7], %s2627_s1, %s2627_s1, %s2626_s25  }
  0x3f   :  { %s1982_s0 = scalar_lea.hbm %s2605_s5, 1024 }
  0x40   :  { %p1983_p10 = scmp.ne.s32.totalorder %s2605_s5, %s1982_s0  ;;  %p1986_p11 = scmp.lt.u32.totalorder %s1982_s0, %s2605_s5 }
  0x42   :  { %p1988_p12 = pnand %p1986_p11, %p1983_p10 }
  0x44   :  { %1991 = shalt.err (!%p1988_p12)
}
  0x45   :  { %s1992_s16 = scalar_lea.vmem %s2159_s27, 1024  ;;  %p1997_p0 = scmp.lt.s32.totalorder %s2159_s27, %s2159_s27 }
  0x46   :  { %p1993_p13 = scmp.ne.s32.totalorder %s2159_s27, %s1992_s16  ;;  %p1998_p1 = scmp.lt.s32.totalorder %s1992_s16, %s1992_s16 }
  0x48   :  { %p1999_p2 = por %p1998_p1, %p1997_p0 }
  0x4a   :  { %p2000_p3 = pnand %p1999_p2, %p1993_p13 }
  0x4c   :  { %2003 = shalt.err (!%p2000_p3)
}
  0x4d   :  { %77 = dma.hbm_to_vmem [thread:$0]  %s2605_s5, 1024, %s2159_s27, [#allocation10], %s2627_s1, %s2627_s1, %s2626_s25  }
  0x4e   :  { %2026 = dma.done.wait [#allocation4], 1024  }
  0x4f   :  { %2027 = vsyncadd [#allocation4], 4294966272 }
  0x50   :  { %2028 = dma.done.wait [#allocation7], 1536  }
  0x51   :  { %2029 = vsyncadd [#allocation7], 4294965760 }
  0x52   :  { %2030 = dma.done.wait [#allocation10], 1024  }
  0x53   :  { %2031 = vsyncadd [#allocation10], 4294966272  ;;  %v509_v0 = vlaneseq  ;;  %v2042_v1 = vmov 0   ;;  %v2043_v2 = vmov 1966171168   ;;  %v2044_v4 = vmov 0.0  }
  0x54   :  { %1832 = vset.pattern.permute.xlu0 %v2042_v1  ;;  %v507_v3 = vunpack.c.l.s4 %v2043_v2  ;;  %1689 = vmatprep.subr.bf16.mxu0 %v2044_v4  ;;  %v192_v8 = vld [vmem:[%s2602_s2] sm:$0xff]  ;;  %v1837_v12 = vld [vmem:[%s2604_s4 + $0x14] ss:$8 sps:$4 sm:$0xff]   ;;  %v1839_v15 = vld [vmem:[%s2604_s4 + $0x10] ss:$8 sps:$4 sm:$0xff]   ;;  %vm2045_vm1 = vmmov 0  }
  0x55   :  { %v510_v5 = vshrl.u32 %v509_v0, 7  ;;  %463 = vmatprep.mubr.bf16.mxu1 %v2042_v1  ;;  %1833 = vset.pattern.permute.xlu1 %v2042_v1  ;;  %vm201_vm0 = vcmp.eq.f32.partialorder %v192_v8, 0.0  ;;  %v1834_v9 = vld [vmem:[%s2604_s4 + $0x4] ss:$8 sps:$4 sm:$0xff]   ;;  %v1836_v10 = vld [vmem:[%s2604_s4] ss:$8 sps:$4 sm:$0xff]  }
  0x56   :  { %v508_v6 = vunpack.c.0.s8 %v507_v3  ;;  %v202_v11 = vsel %vm201_vm0, 1, %v2042_v1  ;;  %431 = vmatprep.subr.bf16.mxu1 %v1834_v9  ;;  %v1840_v20 = vld [vmem:[%s2604_s4 + $0x24] ss:$8 sps:$4 sm:$0xff]   ;;  %1705 = vmatprep.mubr.msk.bf16.mxu0 %vm2045_vm1, %v2044_v4  ;;  %v1842_v24 = vld [vmem:[%s2604_s4 + $0x20] ss:$8 sps:$4 sm:$0xff]   ;;  %v1854_v36 = vld [vmem:[#allocation8 + $0x10] sm:$0xff]  }
  0x57   :  { %204 = vperm.xlu0 %1832, %v202_v11   ;;  %v707_v13 = vcombine.high %v202_v11, %v202_v11  ;;  %432 = vmatpush1.bf16.msra.mxu1 %v1836_v10  ;;  %v2219_v16 = vsub.s32 0, %v510_v5  ;;  %v1846_v21 = vld [vmem:[#allocation8] sm:$0xff]   ;;  %v1850_v26 = vld [vmem:[#allocation8 + $0x8] sm:$0xff]   ;;  %v1843_v30 = vld [vmem:[%s2604_s4 + $0x34] ss:$8 sps:$4 sm:$0xff]   ;;  %vm216_vm6 = vcmask 1041409  }
  0x58   :  { %v2200_v7 = vsub.s32 %v508_v6, %v510_v5  ;;  %433 = vmatprep.subr.bf16.mxu1 %v1837_v12  ;;  %1690 = vmatpush3.bf16.msra.mxu0 %v1846_v21  ;;  %v1845_v32 = vld [vmem:[%s2604_s4 + $0x30] ss:$8 sps:$4 sm:$0xff]   ;;  %v1847_v35 = vld [vmem:[%s2604_s4 + $0x44] ss:$8 sps:$4 sm:$0xff]   ;;  %v1849_v39 = vld [vmem:[%s2604_s4 + $0x40] ss:$8 sps:$4 sm:$0xff]  }
  0x59   :  { %1691 = vmatprep.subr.bf16.mxu0 %v2044_v4  ;;  %v1858_v41 = vld [vmem:[#allocation8 + $0x18] sm:$0xff]   ;;  %v1862_v45 = vld [vmem:[#allocation8 + $0x20] sm:$0xff]   ;;  %v1864_v48 = vld [vmem:[#allocation8 + $0x28] sm:$0xff]   ;;  %vm219_vm7 = vcmask 1042434   ;;  %vm222_vm8 = vcmask 1043459   ;;  %vm225_vm9 = vcmask 1044484  }
  0x5a   :  { %v714_v14 = vrot.slane %v202_v11, %v2200_v7  ;;  %v2222_v17 = vrot.slane %v707_v13, %v2200_v7  ;;  %v1851_v42 = vld [vmem:[%s2604_s4 + $0x54] ss:$8 sps:$4 sm:$0xff]   ;;  %v1853_v44 = vld [vmem:[%s2604_s4 + $0x50] ss:$8 sps:$4 sm:$0xff]   ;;  %v1855_v46 = vld [vmem:[%s2604_s4 + $0x64] ss:$8 sps:$4 sm:$0xff]  }
  0x5b   :  { %434 = vmatpush1.bf16.msra.mxu1 %v1839_v15  ;;  %v1857_v47 = vld [vmem:[%s2604_s4 + $0x60] ss:$8 sps:$4 sm:$0xff]   ;;  %v1859_v49 = vld [vmem:[%s2604_s4 + $0x74] ss:$8 sps:$4 sm:$0xff]   ;;  %v1861_v52 = vld [vmem:[%s2604_s4 + $0x70] ss:$8 sps:$4 sm:$0xff]  }
  0x5c   :  { %v722_v18 = vcombine.high %v714_v14, %v714_v14  ;;  %v2225_v19 = vrot.slane %v714_v14, %v2200_v7  ;;  %v723_v22 = vcombine.high %v2222_v17, %v2222_v17  ;;  %435 = vmatprep.subr.bf16.mxu1 %v1840_v20  ;;  %1692 = vmatpush3.bf16.msra.mxu0 %v1850_v26  ;;  %v166_v50 = vld [vmem:[%s2613_s13] sm:$0xff]  ;;  %v167_v51 = vld [vmem:[%s2613_s13 + $0x8] sm:$0xff]  ;;  %v1865_v53 = vld [vmem:[#allocation8 + $0x30] sm:$0xff]   ;;  %vm228_vm10 = vcmask 1045509   ;;  %s2046_s24 = smov [#allocation11]  }
  0x5d   :  { %1693 = vmatprep.subr.bf16.mxu0 %v2044_v4  ;;  %v1863_v54 = vld [vmem:[#allocation6] sm:$0xff]   ;;  %v1787_v55 = vpack.c.bf16 %v167_v51, %v166_v50  ;;  %v168_v56 = vld [vmem:[%s2613_s13 + $0x10] sm:$0xff]  ;;  %v169_v57 = vld [vmem:[%s2613_s13 + $0x18] sm:$0xff]  ;;  %vm231_vm11 = vcmask 1046534   ;;  %vm234_vm12 = vcmask 1047559   ;;  %s1571_s26 = sshll.u32 %s2046_s24, 4  ;;  %s1572_s26 = int_to_ptr.vmem [resolvable:$true] %s1571_s26 }
  0x5e   :  { %v2235_v23 = vrot.slane %v722_v18, %v2200_v7  ;;  %vm756_vm2 = vcmp.ne.s32.totalorder %v2225_v19, 0  ;;  %v751_v29 = vrot.slane %v723_v22, %v2200_v7  ;;  %v1867_v58 = vld [vmem:[#allocation8 + $0x38] sm:$0xff]   ;;  %v1791_v59 = vpack.c.bf16 %v169_v57, %v168_v56  ;;  %v170_v60 = vld [vmem:[%s2613_s13 + $0x20] sm:$0xff]  ;;  %v171_v61 = vld [vmem:[%s2613_s13 + $0x28] sm:$0xff]  ;;  %s2004_s28 = scalar_lea.vmem %s1572_s26, 128  ;;  %p2009_p5 = scmp.lt.s32.totalorder %s1572_s26, %s1572_s26 }
  0x5f   :  { %v764_v25 = vsel %vm756_vm2, 1, %v2042_v1  ;;  %436 = vmatpush1.bf16.msra.mxu1 %v1842_v24  ;;  %v1795_v62 = vpack.c.bf16 %v171_v61, %v170_v60  ;;  %v1866_v63 = vld [vmem:[#allocation6 + $0x8] sm:$0xff]   ;;  %v172_v0 = vld [vmem:[%s2613_s13 + $0x30] sm:$0xff]  ;;  %v173_v2 = vld [vmem:[%s2613_s13 + $0x38] sm:$0xff]  ;;  %p2005_p4 = scmp.ne.s32.totalorder %s1572_s26, %s2004_s28  ;;  %p2010_p6 = scmp.lt.s32.totalorder %s2004_s28, %s2004_s28 }
  0x60   :  { %v775_v27 = vrot.slane %v764_v25, %v2219_v16  ;;  %v754_v28 = vcombine.high %v2235_v23, %v2235_v23  ;;  %vm761_vm4 = vcmp.ne.s32.totalorder %v751_v29, 0  ;;  %v755_v31 = vcombine.high %v751_v29, %v751_v29  ;;  %437 = vmatprep.subr.bf16.mxu1 %v1843_v30  ;;  %1694 = vmatpush3.bf16.msra.mxu0 %v1854_v36  ;;  %v1868_v5 = vld [vmem:[#allocation6 + $0x10] sm:$0xff]   ;;  %v1869_v6 = vld [vmem:[#allocation6 + $0x18] sm:$0xff]   ;;  %v185_v8 = vld [vmem:[#allocation3 + $0x8] sm:$0xff] }
  0x61   :  { %v769_v34 = vsel %vm761_vm4, 1, %v2042_v1  ;;  %1695 = vmatprep.subr.bf16.mxu0 %v2044_v4  ;;  %v1799_v3 = vpack.c.bf16 %v173_v2, %v172_v0  ;;  %v186_v9 = vld [vmem:[#allocation3 + $0x10] sm:$0xff]  ;;  %v215_v10 = vrot.slane %v185_v8, 7  ;;  %v184_v11 = vld [vmem:[#allocation3] sm:$0xff]  ;;  %v187_v12 = vld [vmem:[#allocation3 + $0x18] sm:$0xff]  ;;  %vm757_vm0 = vcmp.ne.s32.totalorder %v2235_v23, 0  ;;  %p2011_p7 = por %p2010_p6, %p2009_p5 }
  0x62   :  { %805 = vperm.xlu0 %1832, %v775_v27   ;;  %vm759_vm3 = vcmp.ne.s32.totalorder %v754_v28, 0  ;;  %vm763_vm5 = vcmp.ne.s32.totalorder %v755_v31, 0  ;;  %v795_v38 = vrot.slane %v769_v34, %v2219_v16  ;;  %v218_v13 = vrot.slane %v186_v9, 6  ;;  %v188_v15 = vld [vmem:[#allocation3 + $0x20] sm:$0xff]  ;;  %v189_v21 = vld [vmem:[#allocation3 + $0x28] sm:$0xff]  ;;  %v190_v25 = vld [vmem:[#allocation3 + $0x30] sm:$0xff] }
  0x63   :  { %v767_v33 = vsel %vm759_vm3, 1, %v2042_v1  ;;  %v771_v40 = vsel %vm763_vm5, 1, %v2042_v1  ;;  %438 = vmatpush1.bf16.msra.mxu1 %v1845_v32  ;;  %v217_v14 = vsel %vm216_vm6, %v215_v10, %v184_v11  ;;  %v221_v18 = vrot.slane %v187_v12, 5  ;;  %v191_v28 = vld [vmem:[#allocation3 + $0x38] sm:$0xff]  ;;  %v174_v31 = vld [vmem:[%s2613_s13 + $0x40] sm:$0xff]  ;;  %v175_v32 = vld [vmem:[%s2613_s13 + $0x48] sm:$0xff]  ;;  %p2012_p8 = pnand %p2011_p7, %p2005_p4 }
  0x64   :  { %v787_v37 = vrot.slane %v767_v33, %v2219_v16  ;;  %439 = vmatprep.subr.bf16.mxu1 %v1847_v35  ;;  %v803_v43 = vrot.slane %v771_v40, %v2219_v16  ;;  %1696 = vmatpush3.bf16.msra.mxu0 %v1858_v41  ;;  %v220_v20 = vsel %vm219_vm7, %v218_v13, %v217_v14  ;;  %v224_v22 = vrot.slane %v188_v15, 4  ;;  %v176_v33 = vld [vmem:[%s2613_s13 + $0x50] sm:$0xff]  ;;  %v177_v35 = vld [vmem:[%s2613_s13 + $0x58] sm:$0xff] }
  0x65   :  { %1697 = vmatprep.subr.bf16.mxu0 %v2044_v4  ;;  %v223_v24 = vsel %vm222_vm8, %v221_v18, %v220_v20  ;;  %v227_v26 = vrot.slane %v189_v21, 3  ;;  %v230_v29 = vrot.slane %v190_v25, 2  ;;  %v1803_v34 = vpack.c.bf16 %v175_v32, %v174_v31 }
  0x66   :  { %814 = vperm.xlu0 %1832, %v787_v37   ;;  %v226_v27 = vsel %vm225_vm9, %v224_v22, %v223_v24  ;;  %v233_v36 = vrot.slane %v191_v28, 1  ;;  %v1807_v37 = vpack.c.bf16 %v177_v35, %v176_v33  ;;  %v765_v50 = vsel %vm757_vm0, 1, %v2042_v1 }
  0x67   :  { %440 = vmatpush1.bf16.msra.mxu1 %v1849_v39  ;;  %v229_v30 = vsel %vm228_vm10, %v227_v26, %v226_v27  ;;  %v779_v51 = vrot.slane %v765_v50, %v2219_v16 }
  0x68   :  { %441 = vmatprep.subr.bf16.mxu1 %v1851_v42  ;;  %1698 = vmatpush3.bf16.msra.mxu0 %v1862_v45  ;;  %v178_v42 = vld [vmem:[%s2613_s13 + $0x60] sm:$0xff]  ;;  %v180_v45 = vld [vmem:[%s2613_s13 + $0x70] sm:$0xff] }
  0x69   :  { %1699 = vmatprep.subr.bf16.mxu0 %v2044_v4  ;;  %808 = vperm.xlu1 %1833, %v779_v51  }
  0x6a   :  { %820 = vperm.xlu0 %1832, %v795_v38   ;;  %v232_v38 = vsel %vm231_vm11, %v230_v29, %v229_v30 }
  0x6b   :  { %442 = vmatpush1.bf16.msra.mxu1 %v1853_v44  ;;  %v2335_v39 = vsel %vm234_vm12, %v233_v36, %v232_v38 }
  0x6c   :  { %443 = vmatprep.subr.bf16.mxu1 %v1855_v46  ;;  %1700 = vmatpush3.bf16.msra.mxu0 %v1864_v48  ;;  %v1593_v41 = vpack.c.bf16 %v2335_v39, %v2335_v39  ;;  %v181_v46 = vld [vmem:[%s2613_s13 + $0x78] sm:$0xff]  ;;  %v752_v48 = vcombine.high %v2225_v19, %v2225_v19 }
  0x6d   :  { %1701 = vmatprep.subr.bf16.mxu0 %v2044_v4 }
  0x6e   :  { %826 = vperm.xlu0 %1832, %v803_v43   ;;  %v179_v43 = vld [vmem:[%s2613_s13 + $0x68] sm:$0xff]  ;;  %vm758_vm2 = vcmp.ne.s32.totalorder %v752_v48, 0  ;;  %v182_v48 = vld [vmem:[%s2614_s14] sm:$0xff] }
  0x6f   :  { %444 = vmatpush1.bf16.msra.mxu1 %v1857_v47  ;;  %v1811_v44 = vpack.c.bf16 %v179_v43, %v178_v42  ;;  %v1815_v47 = vpack.c.bf16 %v181_v46, %v180_v45 }
  0x70   :  { %445 = vmatprep.subr.bf16.mxu1 %v1859_v49  ;;  %1702 = vmatpush3.bf16.msra.mxu0 %v1865_v53  ;;  %v737_v49 = vrot.slane %v2222_v17, %v2200_v7  ;;  %v766_v53 = vsel %vm758_vm2, 1, %v2042_v1 }
  0x71   :  { %1703 = vmatprep.subr.bf16.mxu0 %v2044_v4 }
  0x72   :  { %vm760_vm3 = vcmp.ne.s32.totalorder %v737_v49, 0 }
  0x73   :  { %446 = vmatpush1.bf16.msra.mxu1 %v1861_v52  ;;  %v753_v52 = vcombine.high %v737_v49, %v737_v49  ;;  %v768_v23 = vsel %vm760_vm3, 1, %v2042_v1 }
  0x74   :  { %1788 = vmatprep.subr.bf16.mxu1 %v1787_v55  ;;  %1704 = vmatpush3.bf16.msra.mxu0 %v1867_v58  ;;  %v791_v17 = vrot.slane %v768_v23, %v2219_v16 }
  0x75   :  { %vm762_vm4 = vcmp.ne.s32.totalorder %v753_v52, 0  ;;  %1753 = vmatprep.subr.mxu0 %v182_v48 }
  0x76   :  { %464 = vmatmul.mubr.bf16.vlgmr.msra.gmra.mrb[0].mxu1 %v1863_v54  ;;  %v783_v54 = vrot.slane %v766_v53, %v2219_v16  ;;  %v770_v58 = vsel %vm762_vm4, 1, %v2042_v1 }
  0x77   :  { %473 = vmatprep.mubr.bf16.mxu1 %v2042_v1  ;;  %1790 = vmatpush3.bf16.msra.mxu1 %v1787_v55 }
  0x78   :  { %1792 = vmatprep.subr.bf16.mxu1 %v1791_v59  ;;  %811 = vperm.xlu1 %1833, %v783_v54  }
  0x7b   :  { %1794 = vmatpush3.bf16.msra.mxu1 %v1791_v59  ;;  %v799_v59 = vrot.slane %v770_v58, %v2219_v16 }
  0x7c   :  { %1796 = vmatprep.subr.bf16.mxu1 %v1795_v62  ;;  %817 = vperm.xlu1 %1833, %v791_v17  }
  0x7e   :  { %474 = vmatmul.mubr.bf16.gmra.mrb[4].mxu1 %v1866_v63 }
  0x7f   :  { %483 = vmatprep.mubr.bf16.mxu1 %v2042_v1  ;;  %1798 = vmatpush3.bf16.msra.mxu1 %v1795_v62 }
  0x80   :  { %1800 = vmatprep.subr.bf16.mxu1 %v1799_v3  ;;  %823 = vperm.xlu1 %1833, %v799_v59  }
  0x83   :  { %1802 = vmatpush3.bf16.msra.mxu1 %v1799_v3 }
  0x84   :  { %1804 = vmatprep.subr.bf16.mxu1 %v1803_v34 }
  0x86   :  { %484 = vmatmul.mubr.bf16.gmra.mrb[8].mxu1 %v1868_v5 }
  0x87   :  { %493 = vmatprep.mubr.bf16.mxu1 %v2042_v1  ;;  %1806 = vmatpush3.bf16.msra.mxu1 %v1803_v34 }
  0x88   :  { %1808 = vmatprep.subr.bf16.mxu1 %v1807_v37 }
  0x8b   :  { %1810 = vmatpush3.bf16.msra.mxu1 %v1807_v37 }
  0x8c   :  { %1812 = vmatprep.subr.bf16.mxu1 %v1811_v44 }
  0x8e   :  { %494 = vmatmul.mubr.bf16.gmra.mrb[12].mxu1 %v1869_v6 }
  0x8f   :  { %1814 = vmatpush3.bf16.msra.mxu1 %v1811_v44 }
  0x90   :  { %1816 = vmatprep.subr.bf16.mxu1 %v1815_v47 }
  0x93   :  { %1818 = vmatpush3.bf16.msra.mxu1 %v1815_v47 }
  0xd6   :  { %v2337_v40 = vpop.permute.xlu0 %204 }
  0xd7   :  { %vm206_vm13 = vcmp.eq.s32.totalorder %v2337_v40, 1 }
  0xd8   :  { %vm1590_vm14 = vmneg %vm206_vm13 }
  0xd9   :  { %vm1592_vm15 = vmpackc.low %vm1590_vm14, %vm1590_vm14 }
  0xda   :  { %1706 = vmatmul.mubr.msk.bf16.vlgmr.msra.gmra.mrb[0].mxu0 %vm1592_vm15, %v1593_v41  ;;  %vm852_vm15 = vcmask 64512  }
  0xdb   :  { %1754 = vmatpush3.msra.mxu0 %v182_v48 }
  0xdc   :  { %1767 = vmatprep.subr.bf16.mxu0 %v2044_v4 }
  0xe1   :  { %v806_v49 = vpop.permute.xlu0 %805 }
  0xe2   :  { %vm828_vm14 = vcmp.eq.s32.totalorder %v806_v49, 1 }
  0xe5   :  { %v815_v51 = vpop.permute.xlu0 %814 }
  0xe6   :  { %vm831_vm0 = vcmp.eq.s32.totalorder %v815_v51, 1 }
  0xe8   :  { %v809_v50 = vpop.permute.xlu1 %808 }
  0xe9   :  { %vm829_vm5 = vcmp.eq.s32.totalorder %v809_v50, 1  ;;  %v821_v23 = vpop.permute.xlu0 %820 }
  0xea   :  { %vm833_vm3 = vcmp.eq.s32.totalorder %v821_v23, 1 }
 0x149   :  { %v465_v55 = vpop.f32.mrb[0].mxu1 }
 0x14a   :  { %v2366_v19 = vpop.f32.mrb[1].mxu1 }
 0x14b   :  { %v469_v56 = vpop.f32.mrb[2].mxu1 }
 0x14c   :  { %v2369_v57 = vpop.f32.mrb[3].mxu1 }
 0x151   :  { %v475_v60 = vpop.f32.mrb[4].mxu1 }
 0x152   :  { %v2373_v61 = vpop.f32.mrb[5].mxu1 }
 0x153   :  { %v479_v62 = vpop.f32.mrb[6].mxu1 }
 0x154   :  { %v2375_v63 = vpop.f32.mrb[7].mxu1 }
 0x159   :  { %v485_v0 = vpop.f32.mrb[8].mxu1 }
 0x15a   :  { %v2377_v2 = vpop.f32.mrb[9].mxu1 }
 0x15b   :  { %v489_v3 = vpop.f32.mrb[10].mxu1 }
 0x15c   :  { %v2379_v5 = vpop.f32.mrb[11].mxu1 }
 0x161   :  { %v495_v6 = vpop.f32.mrb[12].mxu1 }
 0x162   :  { %v2381_v8 = vpop.f32.mrb[13].mxu1 }
 0x163   :  { %v499_v1 = vpop.f32.mrb[14].mxu1 }
 0x164   :  { %v2383_v9 = vpop.f32.mrb[15].mxu1 }
 0x1ad   :  { %v321_v10 = vpop.f32.mrb[0].mxu0 }
 0x1ae   :  { %v505_v11 = vcombine.high %v321_v10, %v321_v10  ;;  %v512_v12 = vrot.slane %v321_v10, %v2200_v7  ;;  %v1707_v13 = vpop.f32.mrb[1].mxu0 }
 0x1af   :  { %v324_v14 = vpop.f32.mrb[2].mxu0 }
 0x1b0   :  { %v519_v15 = vrot.slane %v505_v11, %v2200_v7  ;;  %v520_v18 = vcombine.high %v512_v12, %v512_v12  ;;  %v528_v20 = vrot.slane %v512_v12, %v2200_v7  ;;  %v1708_v21 = vpop.f32.mrb[3].mxu0  ;;  %v827_v14 = vpop.permute.xlu0 %826 }
 0x1b2   :  { %v521_v22 = vcombine.high %v519_v15, %v519_v15  ;;  %v542_v24 = vrot.slane %v520_v18, %v2200_v7  ;;  %v550_v25 = vcombine.high %v528_v20, %v528_v20  ;;  %v557_v26 = vrot.slane %v528_v20, %v2219_v16 }
 0x1b3   :  { %v535_v27 = vrot.slane %v519_v15, %v2200_v7 }
 0x1b4   :  { %v561_v28 = vrot.slane %v542_v24, %v2219_v16  ;;  %v552_v29 = vcombine.high %v542_v24, %v542_v24  ;;  %v549_v30 = vrot.slane %v521_v22, %v2200_v7  ;;  %v594_v31 = vmul.f32 %v557_v26, %v465_v55 }
 0x1b5   :  { %v573_v32 = vrot.slane %v535_v27, %v2219_v16  ;;  %v551_v33 = vcombine.high %v535_v27, %v535_v27  ;;  %v565_v34 = vrot.slane %v550_v25, %v2219_v16 }
 0x1b6   :  { %v595_v35 = vmul.f32 %v561_v28, %v469_v56  ;;  %v569_v36 = vrot.slane %v552_v29, %v2219_v16  ;;  %v577_v37 = vrot.slane %v549_v30, %v2219_v16  ;;  %1741 = vmatprep.mubr.f32.mxu1 %v594_v31  ;;  %v553_v38 = vcombine.high %v549_v30, %v549_v30 }
 0x1b7   :  { %v598_v41 = vmul.f32 %v573_v32, %v485_v0  ;;  %v581_v42 = vrot.slane %v551_v33, %v2219_v16  ;;  %v596_v43 = vmul.f32 %v565_v34, %v475_v60 }
 0x1b8   :  { %v597_v44 = vmul.f32 %v569_v36, %v479_v62  ;;  %v599_v45 = vmul.f32 %v577_v37, %v489_v3  ;;  %1742 = vmatmul.mubr.f32.vlgmr.msra.gmra.mrb[16].mxu1 %v595_v35  ;;  %v585_v7 = vrot.slane %v553_v38, %v2219_v16  ;;  %v812_v16 = vpop.permute.xlu1 %811 }
 0x1b9   :  { %v600_v46 = vmul.f32 %v581_v42, %v495_v6  ;;  %1744 = vmatprep.mubr.f32.mxu1 %v596_v43  ;;  %vm830_vm2 = vcmp.eq.s32.totalorder %v812_v16, 1 }
 0x1ba   :  { %v601_v47 = vmul.f32 %v585_v7, %v499_v1 }
 0x1bc   :  { %1745 = vmatmul.mubr.f32.gmra.mrb[18].mxu1 %v597_v44  ;;  %v818_v17 = vpop.permute.xlu1 %817 }
 0x1bd   :  { %1747 = vmatprep.mubr.f32.mxu1 %v598_v41  ;;  %vm832_vm4 = vcmp.eq.s32.totalorder %v818_v17, 1 }
 0x1c0   :  { %1748 = vmatmul.mubr.f32.gmra.mrb[20].mxu1 %v599_v45  ;;  %v824_v21 = vpop.permute.xlu1 %823 }
 0x1c1   :  { %1750 = vmatprep.mubr.f32.mxu1 %v600_v46 }
 0x1c4   :  { %1751 = vmatmul.mubr.f32.gmra.mrb[22].mxu1 %v601_v47 }
 0x28b   :  { %v1743_v52 = vpop.f32.mrb[16].mxu1 }
 0x28c   :  { %v837_v53 = vsel %vm829_vm5, -1e+09, %v1743_v52  ;;  %v668_v54 = vpop.f32.mrb[17].mxu1  ;;  %vm835_vm5 = vcmp.eq.s32.totalorder %v827_v14, 1 }
 0x28d   :  { %v2403_v55 = vmul.f32 0.25, %v837_v53  ;;  %v836_v56 = vsel %vm828_vm14, -1e+09, %v668_v54  ;;  %vm834_vm14 = vcmp.eq.s32.totalorder %v824_v21, 1 }
 0x28e   :  { %v2405_v58 = vmul.f32 0.25, %v836_v56 }
 0x28f   :  { %v860_v59 = vsel %vm852_vm15, %v2403_v55, -inf  ;;  %v1746_v60 = vpop.f32.mrb[18].mxu1 }
 0x290   :  { %v861_v62 = vrot.slane %v860_v59, 4  ;;  %v853_v0 = vsel %vm852_vm15, %v2405_v58, -inf  ;;  %v839_v3 = vsel %vm831_vm0, -1e+09, %v1746_v60  ;;  %v678_v6 = vpop.f32.mrb[19].mxu1 }
 0x291   :  { %v854_v1 = vrot.slane %v853_v0, 4  ;;  %v2411_v10 = vmul.f32 0.25, %v839_v3  ;;  %v838_v11 = vsel %vm830_vm2, -1e+09, %v678_v6 }
 0x292   :  { %v862_v12 = vmax.f32 %v860_v59, %v861_v62  ;;  %v2413_v13 = vmul.f32 0.25, %v838_v11 }
 0x293   :  { %v855_v15 = vmax.f32 %v853_v0, %v854_v1  ;;  %v874_v18 = vsel %vm852_vm15, %v2411_v10, -inf  ;;  %v1749_v20 = vpop.f32.mrb[20].mxu1 }
 0x294   :  { %v863_v22 = vrot.slane %v862_v12, 2  ;;  %v875_v24 = vrot.slane %v874_v18, 4  ;;  %v867_v25 = vsel %vm852_vm15, %v2413_v13, -inf  ;;  %v841_v26 = vsel %vm833_vm3, -1e+09, %v1749_v20  ;;  %v688_v27 = vpop.f32.mrb[21].mxu1 }
 0x295   :  { %v856_v28 = vrot.slane %v855_v15, 2  ;;  %v868_v29 = vrot.slane %v867_v25, 4  ;;  %v2419_v30 = vmul.f32 0.25, %v841_v26  ;;  %v840_v31 = vsel %vm832_vm4, -1e+09, %v688_v27 }
 0x296   :  { %v864_v32 = vmax.f32 %v862_v12, %v863_v22  ;;  %v876_v33 = vmax.f32 %v874_v18, %v875_v24  ;;  %v848_v34 = vmul.f32 0.25, %v840_v31 }
 0x297   :  { %v857_v35 = vmax.f32 %v855_v15, %v856_v28  ;;  %v869_v36 = vmax.f32 %v867_v25, %v868_v29  ;;  %v888_v37 = vsel %vm852_vm15, %v2419_v30, -inf  ;;  %v1752_v38 = vpop.f32.mrb[22].mxu1 }
 0x298   :  { %v865_v41 = vrot.slane %v864_v32, 1  ;;  %v877_v42 = vrot.slane %v876_v33, 2  ;;  %v889_v43 = vrot.slane %v888_v37, 4  ;;  %v881_v44 = vsel %vm852_vm15, %v848_v34, -inf  ;;  %v698_v45 = vpop.f32.mrb[23].mxu1 }
 0x299   :  { %v858_v7 = vrot.slane %v857_v35, 1  ;;  %v870_v46 = vrot.slane %v869_v36, 2  ;;  %v882_v47 = vrot.slane %v881_v44, 4  ;;  %v843_v48 = vsel %vm835_vm5, -1e+09, %v1752_v38 }
 0x29a   :  { %v866_v49 = vmax.f32 %v864_v32, %v865_v41  ;;  %v878_v50 = vmax.f32 %v876_v33, %v877_v42  ;;  %v890_v51 = vmax.f32 %v888_v37, %v889_v43  ;;  %v851_v16 = vmul.f32 0.25, %v843_v48 }
 0x29b   :  { %v859_v52 = vmax.f32 %v857_v35, %v858_v7  ;;  %v871_v53 = vmax.f32 %v869_v36, %v870_v46  ;;  %v883_v54 = vmax.f32 %v881_v44, %v882_v47  ;;  %v842_v23 = vsel %vm834_vm14, -1e+09, %v698_v45 }
 0x29c   :  { %v910_v56 = vsub.f32 %v2403_v55, %v866_v49  ;;  %v879_v17 = vrot.slane %v878_v50, 1  ;;  %v891_v59 = vrot.slane %v890_v51, 2  ;;  %v902_v60 = vsel %vm852_vm15, %v851_v16, -inf }
 0x29d   :  { %v909_v62 = vsub.f32 %v2405_v58, %v859_v52  ;;  %v872_v0 = vrot.slane %v871_v53, 1  ;;  %v884_v3 = vrot.slane %v883_v54, 2  ;;  %v903_v6 = vrot.slane %v902_v60, 4 }
 0x29e   :  { %v919_v1 = vmul.f32 1.442695, %v910_v56  ;;  %v880_v11 = vmax.f32 %v878_v50, %v879_v17  ;;  %v892_v12 = vmax.f32 %v890_v51, %v891_v59  ;;  %v850_v14 = vmul.f32 0.25, %v842_v23 }
 0x29f   :  { %v917_v15 = vmul.f32 1.442695, %v909_v62  ;;  %v873_v18 = vmax.f32 %v871_v53, %v872_v0  ;;  %v885_v20 = vmax.f32 %v883_v54, %v884_v3  ;;  %v904_v21 = vmax.f32 %v902_v60, %v903_v6 }
 0x2a0   :  { %1878 = vpow2.f32 %v919_v1  ;;  %v912_v55 = vsub.f32 %v2411_v10, %v880_v11  ;;  %v893_v22 = vrot.slane %v892_v12, 1  ;;  %v895_v24 = vsel %vm852_vm15, %v850_v14, -inf }
 0x2a1   :  { %1880 = vpow2.f32 %v917_v15  ;;  %v911_v58 = vsub.f32 %v2413_v13, %v873_v18  ;;  %v886_v25 = vrot.slane %v885_v20, 1  ;;  %v905_v26 = vrot.slane %v904_v21, 2 }
 0x2a2   :  { %v923_v27 = vmul.f32 1.442695, %v912_v55  ;;  %v894_v28 = vmax.f32 %v892_v12, %v893_v22  ;;  %v896_v29 = vrot.slane %v895_v24, 4 }
 0x2a3   :  { %v921_v31 = vmul.f32 1.442695, %v911_v58  ;;  %v887_v32 = vmax.f32 %v885_v20, %v886_v25  ;;  %v906_v33 = vmax.f32 %v904_v21, %v905_v26 }
 0x2a4   :  { %1882 = vpow2.f32 %v923_v27  ;;  %v914_v35 = vsub.f32 %v2419_v30, %v894_v28  ;;  %v897_v36 = vmax.f32 %v895_v24, %v896_v29 }
 0x2a5   :  { %1884 = vpow2.f32 %v921_v31  ;;  %v913_v10 = vsub.f32 %v848_v34, %v887_v32  ;;  %v907_v37 = vrot.slane %v906_v33, 1 }
 0x2a6   :  { %v927_v38 = vmul.f32 1.442695, %v914_v35  ;;  %v898_v41 = vrot.slane %v897_v36, 2 }
 0x2a7   :  { %v925_v42 = vmul.f32 1.442695, %v913_v10  ;;  %v908_v43 = vmax.f32 %v906_v33, %v907_v37 }
 0x2a8   :  { %1886 = vpow2.f32 %v927_v38  ;;  %v899_v13 = vmax.f32 %v897_v36, %v898_v41 }
 0x2a9   :  { %1888 = vpow2.f32 %v925_v42  ;;  %v916_v44 = vsub.f32 %v851_v16, %v908_v43 }
 0x2aa   :  { %v2433_v45 = vpop.eup %1878  ;;  %v900_v7 = vrot.slane %v899_v13, 1 }
 0x2ab   :  { %v2435_v46 = vpop.eup %1880  ;;  %v940_v30 = vsel %vm852_vm15, %v2433_v45, 0.0  ;;  %v931_v47 = vmul.f32 1.442695, %v916_v44 }
 0x2ac   :  { %v941_v48 = vrot.slane %v940_v30, 4  ;;  %v933_v34 = vsel %vm852_vm15, %v2435_v46, 0.0  ;;  %v901_v49 = vmax.f32 %v899_v13, %v900_v7 }
 0x2ad   :  { %v934_v50 = vrot.slane %v933_v34, 4  ;;  %1890 = vpow2.f32 %v931_v47 }
 0x2ae   :  { %v2441_v51 = vpop.eup %1882  ;;  %v942_v52 = vadd.f32 %v941_v48, %v940_v30  ;;  %v915_v16 = vsub.f32 %v850_v14, %v901_v49 }
 0x2af   :  { %v2443_v53 = vpop.eup %1884  ;;  %v935_v54 = vadd.f32 %v934_v50, %v933_v34  ;;  %v954_v23 = vsel %vm852_vm15, %v2441_v51, 0.0 }
 0x2b0   :  { %v943_v56 = vrot.slane %v942_v52, 2  ;;  %v955_v17 = vrot.slane %v954_v23, 4  ;;  %v947_v59 = vsel %vm852_vm15, %v2443_v53, 0.0  ;;  %v929_v60 = vmul.f32 1.442695, %v915_v16 }
 0x2b1   :  { %v936_v62 = vrot.slane %v935_v54, 2  ;;  %v948_v0 = vrot.slane %v947_v59, 4 }
 0x2b2   :  { %v2449_v3 = vpop.eup %1886  ;;  %v944_v6 = vadd.f32 %v943_v56, %v942_v52  ;;  %v956_v1 = vadd.f32 %v955_v17, %v954_v23  ;;  %1892 = vpow2.f32 %v929_v60 }
 0x2b3   :  { %v2451_v11 = vpop.eup %1888  ;;  %v937_v12 = vadd.f32 %v936_v62, %v935_v54  ;;  %v949_v14 = vadd.f32 %v948_v0, %v947_v59  ;;  %v968_v15 = vsel %vm852_vm15, %v2449_v3, 0.0 }
 0x2b4   :  { %v945_v18 = vrot.slane %v944_v6, 1  ;;  %v957_v20 = vrot.slane %v956_v1, 2  ;;  %v969_v21 = vrot.slane %v968_v15, 4  ;;  %v961_v55 = vsel %vm852_vm15, %v2451_v11, 0.0 }
 0x2b5   :  { %v938_v22 = vrot.slane %v937_v12, 1  ;;  %v950_v24 = vrot.slane %v949_v14, 2  ;;  %v962_v58 = vrot.slane %v961_v55, 4 }
 0x2b6   :  { %v946_v25 = vadd.f32 %v945_v18, %v944_v6  ;;  %v958_v26 = vadd.f32 %v957_v20, %v956_v1  ;;  %v970_v27 = vadd.f32 %v969_v21, %v968_v15 }
 0x2b7   :  { %v1891_v28 = vpop.eup %1890  ;;  %v951_v29 = vadd.f32 %v950_v24, %v949_v14  ;;  %v963_v31 = vadd.f32 %v962_v58, %v961_v55  ;;  %v939_v32 = vadd.f32 %v938_v22, %v937_v12 }
 0x2b8   :  { %1894 = vrcp.f32 %v946_v25  ;;  %v959_v33 = vrot.slane %v958_v26, 1  ;;  %v971_v35 = vrot.slane %v970_v27, 2  ;;  %v982_v36 = vsel %vm852_vm15, %v1891_v28, 0.0 }
 0x2b9   :  { %v952_v10 = vrot.slane %v951_v29, 1  ;;  %v964_v37 = vrot.slane %v963_v31, 2  ;;  %v983_v38 = vrot.slane %v982_v36, 4  ;;  %1896 = vrcp.f32 %v939_v32 }
 0x2ba   :  { %v972_v41 = vadd.f32 %v971_v35, %v970_v27  ;;  %v960_v42 = vadd.f32 %v959_v33, %v958_v26 }
 0x2bb   :  { %v965_v43 = vadd.f32 %v964_v37, %v963_v31  ;;  %v984_v13 = vadd.f32 %v983_v38, %v982_v36  ;;  %v953_v44 = vadd.f32 %v952_v10, %v951_v29 }
 0x2bc   :  { %v1893_v7 = vpop.eup %1892  ;;  %v973_v30 = vrot.slane %v972_v41, 1  ;;  %1898 = vrcp.f32 %v960_v42 }
 0x2bd   :  { %v966_v47 = vrot.slane %v965_v43, 1  ;;  %v985_v48 = vrot.slane %v984_v13, 2  ;;  %v975_v34 = vsel %vm852_vm15, %v1893_v7, 0.0  ;;  %1900 = vrcp.f32 %v953_v44 }
 0x2be   :  { %v976_v49 = vrot.slane %v975_v34, 4  ;;  %v974_v50 = vadd.f32 %v973_v30, %v972_v41 }
 0x2bf   :  { %v986_v52 = vadd.f32 %v985_v48, %v984_v13  ;;  %v967_v16 = vadd.f32 %v966_v47, %v965_v43 }
 0x2c0   :  { %v977_v54 = vadd.f32 %v976_v49, %v975_v34  ;;  %1902 = vrcp.f32 %v974_v50  ;;  %v237_v50 = vsel %vm206_vm13, 0.0, %v2335_v39 }
 0x2c1   :  { %v987_v23 = vrot.slane %v986_v52, 1  ;;  %1904 = vrcp.f32 %v967_v16 }
 0x2c2   :  { %v1895_v56 = vpop.eup %1894  ;;  %v978_v17 = vrot.slane %v977_v54, 2 }
 0x2c3   :  { %v1897_v59 = vpop.eup %1896  ;;  %v998_v0 = vmul.f32 %v1895_v56, %v2433_v45  ;;  %v988_v6 = vadd.f32 %v987_v23, %v986_v52 }
 0x2c4   :  { %v979_v60 = vadd.f32 %v978_v17, %v977_v54  ;;  %v997_v62 = vmul.f32 %v1897_v59, %v2435_v46 }
 0x2c5   :  { %1906 = vrcp.f32 %v988_v6 }
 0x2c6   :  { %v1899_v1 = vpop.eup %1898  ;;  %v980_v12 = vrot.slane %v979_v60, 1  ;;  %1755 = vmatprep.mubr.msk.f32.mxu0 %vm852_vm15, %v997_v62 }
 0x2c7   :  { %v1901_v14 = vpop.eup %1900  ;;  %1756 = vmatmul.mubr.msk.f32.vlgmr.msra.gmra.mrb[4].mxu0 %vm852_vm15, %v998_v0  ;;  %v1000_v20 = vmul.f32 %v1899_v1, %v2441_v51 }
 0x2c8   :  { %v999_v15 = vmul.f32 %v1901_v14, %v2443_v53  ;;  %v981_v18 = vadd.f32 %v980_v12, %v979_v60  ;;  %v1192_v14 = vrot.slane %v237_v50, 2 }
 0x2ca   :  { %v1903_v21 = vpop.eup %1902  ;;  %1758 = vmatprep.mubr.msk.f32.mxu0 %vm852_vm15, %v999_v15  ;;  %1908 = vrcp.f32 %v981_v18 }
 0x2cb   :  { %v1905_v46 = vpop.eup %1904  ;;  %1759 = vmatmul.mubr.msk.f32.gmra.mrb[6].mxu0 %vm852_vm15, %v1000_v20  ;;  %v1002_v55 = vmul.f32 %v1903_v21, %v2449_v3 }
 0x2cc   :  { %v1001_v45 = vmul.f32 %v1905_v46, %v2451_v11 }
 0x2ce   :  { %1761 = vmatprep.mubr.msk.f32.mxu0 %vm852_vm15, %v1001_v45 }
 0x2cf   :  { %1762 = vmatmul.mubr.msk.f32.gmra.mrb[8].mxu0 %vm852_vm15, %v1002_v55  ;;  %v1907_v53 = vpop.eup %1906 }
 0x2d0   :  { %v1004_v51 = vmul.f32 %v1907_v53, %v1891_v28 }
 0x2d4   :  { %v1909_v22 = vpop.eup %1908 }
 0x2d5   :  { %v1003_v24 = vmul.f32 %v1909_v22, %v1893_v7 }
 0x2d7   :  { %1764 = vmatprep.mubr.msk.f32.mxu0 %vm852_vm15, %v1003_v24 }
 0x2d8   :  { %1765 = vmatmul.mubr.msk.f32.gmra.mrb[10].mxu0 %vm852_vm15, %v1004_v51 }
 0x2d9   :  { %1783 = vmatprep.mubr.msk.bf16.mxu0 %vm2045_vm1, %v2044_v4 }
 0x39a   :  { %v1757_v58 = vpop.f32.mrb[4].mxu0 }
 0x39b   :  { %v1135_v11 = vmul.f32 %v1757_v58, %v2369_v57  ;;  %v1095_v25 = vpop.f32.mrb[5].mxu0  ;;  %v1194_v58 = vrot.slane %v237_v50, 4 }
 0x39c   :  { %v1134_v3 = vmul.f32 %v1095_v25, %v2366_v19 }
 0x39d   :  { %v1148_v26 = vrot.slane %v1135_v11, 4 }
 0x39e   :  { %v1142_v27 = vrot.slane %v1134_v3, 4  ;;  %v1760_v29 = vpop.f32.mrb[6].mxu0 }
 0x39f   :  { %v1149_v31 = vadd.f32 %v1148_v26, %v1135_v11  ;;  %v1137_v32 = vmul.f32 %v1760_v29, %v2375_v63  ;;  %v1105_v28 = vpop.f32.mrb[7].mxu0  ;;  %v1193_v26 = vrot.slane %v237_v50, 3 }
 0x3a0   :  { %v1143_v33 = vadd.f32 %v1142_v27, %v1134_v3  ;;  %v1136_v35 = vmul.f32 %v1105_v28, %v2373_v61 }
 0x3a1   :  { %v1150_v36 = vrot.slane %v1149_v31, 2  ;;  %v1160_v10 = vrot.slane %v1137_v32, 4 }
 0x3a2   :  { %v1144_v37 = vrot.slane %v1143_v33, 2  ;;  %v1154_v38 = vrot.slane %v1136_v35, 4  ;;  %v1763_v41 = vpop.f32.mrb[8].mxu0 }
 0x3a3   :  { %v1151_v42 = vadd.f32 %v1150_v36, %v1149_v31  ;;  %v1161_v57 = vadd.f32 %v1160_v10, %v1137_v32  ;;  %v1139_v43 = vmul.f32 %v1763_v41, %v2379_v5  ;;  %v1115_v19 = vpop.f32.mrb[9].mxu0  ;;  %v1195_v36 = vrot.slane %v237_v50, 5 }
 0x3a4   :  { %v1155_v13 = vadd.f32 %v1154_v38, %v1136_v35  ;;  %v1138_v44 = vmul.f32 %v1115_v19, %v2377_v2  ;;  %v1145_v47 = vadd.f32 %v1144_v37, %v1143_v33  ;;  %v1191_v2 = vrot.slane %v237_v50, 1 }
 0x3a5   :  { %v1162_v7 = vrot.slane %v1161_v57, 2  ;;  %v1172_v30 = vrot.slane %v1139_v43, 4  ;;  %v1152_v63 = vrot.slane %v1151_v42, 1  ;;  %v1197_v19 = vrot.slane %v237_v50, 7 }
 0x3a6   :  { %v1156_v48 = vrot.slane %v1155_v13, 2  ;;  %v1166_v34 = vrot.slane %v1138_v44, 4  ;;  %v1146_v23 = vrot.slane %v1145_v47, 1 }
 0x3a7   :  { %v1163_v61 = vadd.f32 %v1162_v7, %v1161_v57  ;;  %v1173_v49 = vadd.f32 %v1172_v30, %v1139_v43  ;;  %v1153_v5 = vadd.f32 %v1152_v63, %v1151_v42 }
 0x3a8   :  { %v1157_v52 = vadd.f32 %v1156_v48, %v1155_v13  ;;  %v1167_v16 = vadd.f32 %v1166_v34, %v1138_v44  ;;  %v1147_v20 = vadd.f32 %v1146_v23, %v1145_v47  ;;  %v1196_v44 = vrot.slane %v237_v50, 6 }
 0x3a9   :  { %v1174_v54 = vrot.slane %v1173_v49, 2  ;;  %v1164_v59 = vrot.slane %v1163_v61, 1  ;;  %v1207_v18 = vadd.f32 %v1191_v2, %v1153_v5 }
 0x3aa   :  { %v1158_v56 = vrot.slane %v1157_v52, 1  ;;  %v1168_v17 = vrot.slane %v1167_v16, 2  ;;  %v1206_v3 = vadd.f32 %v1147_v20, %v237_v50 }
 0x3ab   :  { %v1766_v60 = vpop.f32.mrb[10].mxu0  ;;  %v1175_v0 = vadd.f32 %v1174_v54, %v1173_v49  ;;  %v1165_v53 = vadd.f32 %v1164_v59, %v1163_v61  ;;  %v1222_v25 = vrot.slane %v1207_v18, 7 }
 0x3ac   :  { %v1159_v62 = vadd.f32 %v1158_v56, %v1157_v52  ;;  %v1169_v6 = vadd.f32 %v1168_v17, %v1167_v16  ;;  %v1141_v1 = vmul.f32 %v1766_v60, %v2383_v9  ;;  %v1125_v12 = vpop.f32.mrb[11].mxu0 }
 0x3ad   :  { %v1140_v15 = vmul.f32 %v1125_v12, %v2381_v8  ;;  %v1176_v22 = vrot.slane %v1175_v0, 1  ;;  %v1209_v8 = vadd.f32 %v1193_v26, %v1165_v53  ;;  %v1223_v35 = vsel %vm216_vm6, %v1222_v25, %v1206_v3 }
 0x3ae   :  { %v1170_v21 = vrot.slane %v1169_v6, 1  ;;  %v1184_v46 = vrot.slane %v1141_v1, 4  ;;  %v1208_v45 = vadd.f32 %v1192_v14, %v1159_v62 }
 0x3af   :  { %v1178_v55 = vrot.slane %v1140_v15, 4  ;;  %v1177_v32 = vadd.f32 %v1176_v22, %v1175_v0  ;;  %v1226_v42 = vrot.slane %v1209_v8, 5 }
 0x3b0   :  { %v1171_v24 = vadd.f32 %v1170_v21, %v1169_v6  ;;  %v1185_v51 = vadd.f32 %v1184_v46, %v1141_v1  ;;  %v1224_v27 = vrot.slane %v1208_v45, 6 }
 0x3b1   :  { %v1179_v11 = vadd.f32 %v1178_v55, %v1140_v15  ;;  %v1211_v57 = vadd.f32 %v1195_v36, %v1177_v32  ;;  %v1871_v36 = vld [vmem:[#allocation9 + $0x8] sm:$0xff]  }
 0x3b2   :  { %v1186_v9 = vrot.slane %v1185_v51, 2  ;;  %v1210_v29 = vadd.f32 %v1194_v58, %v1171_v24  ;;  %v1225_v41 = vsel %vm219_vm7, %v1224_v27, %v1223_v35  ;;  %v1870_v35 = vld [vmem:[#allocation9] sm:$0xff]  }
 0x3b3   :  { %v1180_v31 = vrot.slane %v1179_v11, 2  ;;  %v1227_v30 = vsel %vm222_vm8, %v1226_v42, %v1225_v41  ;;  %v1230_v48 = vrot.slane %v1211_v57, 3  ;;  %1768 = vmatpush3.bf16.msra.mxu0 %v1870_v35  ;;  %v1875_v41 = vld [vmem:[#allocation9 + $0x28] sm:$0xff]   ;;  %v1876_v42 = vld [vmem:[#allocation9 + $0x30] sm:$0xff]  }
 0x3b4   :  { %v1187_v28 = vadd.f32 %v1186_v9, %v1185_v51  ;;  %v1228_v37 = vrot.slane %v1210_v29, 4  ;;  %1769 = vmatprep.subr.bf16.mxu0 %v2044_v4 }
 0x3b5   :  { %v1181_v33 = vadd.f32 %v1180_v31, %v1179_v11 }
 0x3b6   :  { %v1188_v10 = vrot.slane %v1187_v28, 1  ;;  %v1229_v47 = vsel %vm225_vm9, %v1228_v37, %v1227_v30  ;;  %v1873_v37 = vld [vmem:[#allocation9 + $0x18] sm:$0xff]  }
 0x3b7   :  { %v1182_v38 = vrot.slane %v1181_v33, 1  ;;  %v1231_v61 = vsel %vm228_vm10, %v1230_v48, %v1229_v47  ;;  %1770 = vmatpush3.bf16.msra.mxu0 %v1871_v36 }
 0x3b8   :  { %v1189_v43 = vadd.f32 %v1188_v10, %v1187_v28  ;;  %v1872_v10 = vld [vmem:[#allocation9 + $0x10] sm:$0xff]   ;;  %1771 = vmatprep.subr.bf16.mxu0 %v2044_v4 }
 0x3b9   :  { %v1183_v13 = vadd.f32 %v1182_v38, %v1181_v33  ;;  %v1874_v38 = vld [vmem:[#allocation9 + $0x20] sm:$0xff]  }
 0x3ba   :  { %v1213_v7 = vadd.f32 %v1197_v19, %v1189_v43 }
 0x3bb   :  { %v1212_v63 = vadd.f32 %v1196_v44, %v1183_v13  ;;  %1772 = vmatpush3.bf16.msra.mxu0 %v1872_v10 }
 0x3bc   :  { %v1234_v49 = vrot.slane %v1213_v7, 1  ;;  %1773 = vmatprep.subr.bf16.mxu0 %v2044_v4 }
 0x3bd   :  { %v1232_v34 = vrot.slane %v1212_v63, 2 }
 0x3bf   :  { %v1233_v52 = vsel %vm231_vm11, %v1232_v34, %v1231_v61  ;;  %1774 = vmatpush3.bf16.msra.mxu0 %v1873_v37 }
 0x3c0   :  { %v1235_v16 = vsel %vm234_vm12, %v1234_v49, %v1233_v52  ;;  %1775 = vmatprep.subr.bf16.mxu0 %v2044_v4 }
 0x3c1   :  { %1237 = vadd.xlane.f32.xlu1 %v1235_v16 }
 0x3c3   :  { %1776 = vmatpush3.bf16.msra.mxu0 %v1874_v38 }
 0x3c4   :  { %1777 = vmatprep.subr.bf16.mxu0 %v2044_v4 }
 0x3c7   :  { %1778 = vmatpush3.bf16.msra.mxu0 %v1875_v41 }
 0x3c8   :  { %1779 = vmatprep.subr.bf16.mxu0 %v2044_v4 }
 0x3cb   :  { %1780 = vmatpush3.bf16.msra.mxu0 %v1876_v42 }
 0x3cc   :  { %1781 = vmatprep.subr.bf16.mxu0 %v2044_v4  ;;  %v1624_v4 = vld [vmem:[%s2608_s8] ss:$0 sm:$0xff] }
 0x44e   :  { %v1238_v54 = vpop.xlane.xlu1 %1237 }
 0x44f   :  { %v1240_v5 = vmul.f32 0.0078125, %v1238_v54 }
 0x451   :  { %v1242_v23 = vrot.slane %v1240_v5, 1  ;;  %v1243_v50 = vrot.slane %v1240_v5, 2  ;;  %v1244_v56 = vrot.slane %v1240_v5, 3  ;;  %v1245_v17 = vrot.slane %v1240_v5, 4 }
 0x452   :  { %v1246_v2 = vrot.slane %v1240_v5, 5  ;;  %v1247_v59 = vrot.slane %v1240_v5, 6  ;;  %v1248_v60 = vrot.slane %v1240_v5, 7  ;;  %v2493_v62 = vsub.f32 %v1206_v3, %v1240_v5 }
 0x453   :  { %v2495_v0 = vsub.f32 %v1207_v18, %v1242_v23  ;;  %v2497_v6 = vsub.f32 %v1208_v45, %v1243_v50  ;;  %v2499_v1 = vsub.f32 %v1209_v8, %v1244_v56  ;;  %v2501_v12 = vsub.f32 %v1210_v29, %v1245_v17 }
 0x454   :  { %v2503_v14 = vsub.f32 %v1211_v57, %v1246_v2  ;;  %v2505_v15 = vsub.f32 %v1212_v63, %v1247_v59  ;;  %v2507_v20 = vsub.f32 %v1213_v7, %v1248_v60  ;;  %v1265_v55 = vmul.f32 %v2493_v62, %v2493_v62  ;;  %v1877_v57 = vld [vmem:[#allocation9 + $0x38] sm:$0xff]   ;;  %v1623_v7 = vld [vmem:[%s2607_s7] ss:$0 sm:$0xff] }
 0x455   :  { %v1266_v21 = vmul.f32 %v2495_v0, %v2495_v0  ;;  %v1267_v46 = vmul.f32 %v2497_v6, %v2497_v6  ;;  %v1268_v18 = vmul.f32 %v2499_v1, %v2499_v1  ;;  %v1269_v45 = vmul.f32 %v2501_v12, %v2501_v12  ;;  %1782 = vmatpush3.bf16.msra.mxu0 %v1877_v57 }
 0x456   :  { %v1270_v53 = vmul.f32 %v2503_v14, %v2503_v14  ;;  %v1271_v51 = vmul.f32 %v2505_v15, %v2505_v15  ;;  %v1272_v58 = vmul.f32 %v2507_v20, %v2507_v20 }
 0x457   :  { %v1281_v22 = vrot.slane %v1266_v21, 7  ;;  %v1283_v24 = vrot.slane %v1267_v46, 6  ;;  %v1285_v25 = vrot.slane %v1268_v18, 5  ;;  %v1287_v26 = vrot.slane %v1269_v45, 4 }
 0x458   :  { %v1289_v27 = vrot.slane %v1270_v53, 3  ;;  %v1291_v31 = vrot.slane %v1271_v51, 2  ;;  %v1293_v32 = vrot.slane %v1272_v58, 1 }
 0x459   :  { %v1282_v11 = vsel %vm216_vm6, %v1281_v22, %v1265_v55 }
 0x45a   :  { %v1284_v3 = vsel %vm219_vm7, %v1283_v24, %v1282_v11 }
 0x45b   :  { %v1286_v9 = vsel %vm222_vm8, %v1285_v25, %v1284_v3 }
 0x45c   :  { %v1288_v29 = vsel %vm225_vm9, %v1287_v26, %v1286_v9 }
 0x45d   :  { %v1290_v8 = vsel %vm228_vm10, %v1289_v27, %v1288_v29 }
 0x45e   :  { %v1292_v28 = vsel %vm231_vm11, %v1291_v31, %v1290_v8 }
 0x45f   :  { %v1294_v33 = vsel %vm234_vm12, %v1293_v32, %v1292_v28 }
 0x460   :  { %1296 = vadd.xlane.f32.xlu0 %v1294_v33 }
 0x4ed   :  { %v1297_v43 = vpop.xlane.xlu0 %1296 }
 0x4ee   :  { %v1298_v19 = vmul.f32 0.0078125, %v1297_v43 }
 0x4f0   :  { %v1299_v13 = vadd.f32 1e-12, %v1298_v19 }
 0x4f2   :  { %1910 = vrsqrt.f32 %v1299_v13 }
 0x4fc   :  { %v1911_v44 = vpop.eup %1910 }
 0x4fd   :  { %v1302_v30 = vrot.slane %v1911_v44, 1  ;;  %v1303_v63 = vrot.slane %v1911_v44, 2  ;;  %v1304_v47 = vrot.slane %v1911_v44, 3  ;;  %v1305_v48 = vrot.slane %v1911_v44, 4 }
 0x4fe   :  { %v1306_v34 = vrot.slane %v1911_v44, 5  ;;  %v1307_v61 = vrot.slane %v1911_v44, 6  ;;  %v1308_v49 = vrot.slane %v1911_v44, 7  ;;  %v1317_v52 = vmul.f32 %v1911_v44, %v2493_v62 }
 0x4ff   :  { %v1318_v16 = vmul.f32 %v1302_v30, %v2495_v0  ;;  %v1319_v54 = vmul.f32 %v1303_v63, %v2497_v6  ;;  %v1320_v5 = vmul.f32 %v1304_v47, %v2499_v1  ;;  %v1321_v23 = vmul.f32 %v1305_v48, %v2501_v12 }
 0x500   :  { %v1322_v50 = vmul.f32 %v1306_v34, %v2503_v14  ;;  %v1323_v56 = vmul.f32 %v1307_v61, %v2505_v15  ;;  %v1324_v17 = vmul.f32 %v1308_v49, %v2507_v20  ;;  %v1331_v2 = vmul.f32 %v1623_v7, %v1317_v52 }
 0x501   :  { %v1332_v59 = vmul.f32 %v1623_v7, %v1318_v16  ;;  %v1333_v60 = vmul.f32 %v1623_v7, %v1319_v54  ;;  %v1334_v62 = vmul.f32 %v1623_v7, %v1320_v5  ;;  %v1335_v21 = vmul.f32 %v1623_v7, %v1321_v23 }
 0x502   :  { %v1336_v46 = vmul.f32 %v1623_v7, %v1322_v50  ;;  %v1337_v18 = vmul.f32 %v1623_v7, %v1323_v56  ;;  %v1338_v0 = vmul.f32 %v1623_v7, %v1324_v17  ;;  %v1345_v45 = vadd.f32 %v1624_v4, %v1331_v2  ;;  %v1625_v17 = vld [vmem:[%s2606_s6] ss:$0 sm:$0xff] }
 0x503   :  { %v1346_v6 = vadd.f32 %v1624_v4, %v1332_v59  ;;  %v1347_v55 = vadd.f32 %v1624_v4, %v1333_v60  ;;  %v1348_v1 = vadd.f32 %v1624_v4, %v1334_v62  ;;  %v1349_v53 = vadd.f32 %v1624_v4, %v1335_v21 }
 0x504   :  { %v1350_v12 = vadd.f32 %v1624_v4, %v1336_v46  ;;  %v1351_v22 = vadd.f32 %v1624_v4, %v1337_v18  ;;  %v1352_v14 = vadd.f32 %v1624_v4, %v1338_v0  ;;  %v1353_v24 = vpack.c.bf16 %v1345_v45, %v1345_v45 }
 0x505   :  { %v1354_v15 = vpack.c.bf16 %v1346_v6, %v1346_v6  ;;  %v1355_v51 = vpack.c.bf16 %v1347_v55, %v1347_v55  ;;  %v1356_v20 = vpack.c.bf16 %v1348_v1, %v1348_v1  ;;  %v1357_v58 = vpack.c.bf16 %v1349_v53, %v1349_v53 }
 0x506   :  { %v1358_v11 = vpack.c.bf16 %v1350_v12, %v1350_v12  ;;  %v1359_v25 = vpack.c.bf16 %v1351_v22, %v1351_v22  ;;  %v1360_v3 = vpack.c.bf16 %v1352_v14, %v1352_v14  ;;  %v1495_v31 = vrot.slane %v1346_v6, 7 }
 0x507   :  { %v1376_v26 = vunpack.c.l.b16 %v1354_v15  ;;  %v1377_v9 = vunpack.c.l.b16 %v1355_v51  ;;  %v1378_v27 = vunpack.c.l.b16 %v1356_v20  ;;  %v1379_v29 = vunpack.c.l.b16 %v1357_v58 }
 0x508   :  { %v1375_v8 = vunpack.c.l.b16 %v1353_v24  ;;  %v1380_v32 = vunpack.c.l.b16 %v1358_v11  ;;  %v1381_v35 = vunpack.c.l.b16 %v1359_v25  ;;  %v1496_v36 = vsel %vm216_vm6, %v1495_v31, %v1345_v45  ;;  %v1635_v24 = vld [vmem:[%s2610_s10] ss:$0 sm:$0xff] }
 0x509   :  { %v1383_v28 = vrot.slane %v1376_v26, 7  ;;  %v1385_v33 = vrot.slane %v1377_v9, 6  ;;  %v1382_v10 = vunpack.c.l.b16 %v1360_v3  ;;  %v1387_v38 = vrot.slane %v1378_v27, 5 }
 0x50a   :  { %v1497_v41 = vrot.slane %v1347_v55, 6  ;;  %v1389_v57 = vrot.slane %v1379_v29, 4  ;;  %v1499_v43 = vrot.slane %v1348_v1, 5  ;;  %v1391_v13 = vrot.slane %v1380_v32, 3  ;;  %v1636_v32 = vld [vmem:[%s2611_s11] ss:$0 sm:$0xff] }
 0x50b   :  { %v1384_v37 = vsel %vm216_vm6, %v1383_v28, %v1375_v8  ;;  %v1501_v7 = vrot.slane %v1349_v53, 4  ;;  %v1393_v63 = vrot.slane %v1381_v35, 2  ;;  %v1503_v48 = vrot.slane %v1350_v12, 3 }
 0x50c   :  { %v1386_v42 = vsel %vm219_vm7, %v1385_v33, %v1384_v37  ;;  %v1498_v44 = vsel %vm219_vm7, %v1497_v41, %v1496_v36  ;;  %v1395_v61 = vrot.slane %v1382_v10, 1  ;;  %v1505_v52 = vrot.slane %v1351_v22, 2  ;;  %v1634_v22 = vld [vmem:[%s2609_s9] ss:$0 sm:$0xff] }
 0x50d   :  { %v1388_v19 = vsel %vm222_vm8, %v1387_v38, %v1386_v42  ;;  %v1500_v47 = vsel %vm222_vm8, %v1499_v43, %v1498_v44  ;;  %v1507_v54 = vrot.slane %v1352_v14, 1  ;;  %v1536_v51 = vstv %s2615_s15 }
 0x50e   :  { %v1390_v30 = vsel %vm225_vm9, %v1389_v57, %v1388_v19  ;;  %v1502_v49 = vsel %vm225_vm9, %v1501_v7, %v1500_v47 }
 0x50f   :  { %v1392_v34 = vsel %vm228_vm10, %v1391_v13, %v1390_v30  ;;  %v1504_v16 = vsel %vm228_vm10, %v1503_v48, %v1502_v49 }
 0x510   :  { %v1394_v4 = vsel %vm231_vm11, %v1393_v63, %v1392_v34  ;;  %v1506_v23 = vsel %vm231_vm11, %v1505_v52, %v1504_v16 }
 0x511   :  { %v1396_v5 = vsel %vm234_vm12, %v1395_v61, %v1394_v4  ;;  %v1508_v56 = vsel %vm234_vm12, %v1507_v54, %v1506_v23 }
 0x512   :  { %v1397_v50 = vpack.c.b16 %v1396_v5, %v1396_v5 }
 0x514   :  { %1784 = vmatmul.mubr.bf16.vlgmr.msra.gmra.mrb[12].mxu0 %v1397_v50 }
 0x5e7   :  { %v1481_v2 = vpop.f32.mrb[12].mxu0 }
 0x5e8   :  { %v1482_v59 = vadd.f32 %v1625_v17, %v1481_v2  ;;  %v1785_v60 = vpop.f32.mrb[13].mxu0 }
 0x5e9   :  { %v1484_v62 = vpop.f32.mrb[14].mxu0 }
 0x5ea   :  { %v1786_v21 = vpop.f32.mrb[15].mxu0  ;;  %v1510_v46 = vadd.f32 %v1508_v56, %v1482_v59 }
 0x5ec   :  { %1511 = vadd.xlane.f32.xlu0 %v1510_v46 }
 0x679   :  { %v1512_v18 = vpop.xlane.xlu0 %1511 }
 0x67a   :  { %v1513_v0 = vmul.f32 0.0078125, %v1512_v18 }
 0x67c   :  { %v1514_v45 = vsub.f32 %v1510_v46, %v1513_v0 }
 0x67e   :  { %v1515_v6 = vmul.f32 %v1514_v45, %v1514_v45 }
 0x680   :  { %1516 = vadd.xlane.f32.xlu1 %v1515_v6 }
 0x70d   :  { %v1517_v55 = vpop.xlane.xlu1 %1516 }
 0x70e   :  { %v1518_v1 = vmul.f32 0.0078125, %v1517_v55 }
 0x710   :  { %v1519_v53 = vadd.f32 1e-12, %v1518_v1 }
 0x712   :  { %1912 = vrsqrt.f32 %v1519_v53 }
 0x71c   :  { %v1913_v12 = vpop.eup %1912 }
 0x71d   :  { %v1521_v14 = vmul.f32 %v1913_v12, %v1514_v45 }
 0x71f   :  { %v1528_v15 = vmul.f32 %v1634_v22, %v1521_v14 }
 0x721   :  { %v1535_v20 = vadd.f32 %v1635_v24, %v1528_v15 }
 0x723   :  { %v1537_v58 = vmul.f32 %v1536_v51, %v1535_v20 }
 0x725   :  { %v1538_v11 = vsel %vm206_vm13, %v2335_v39, %v1537_v58  ;;  %v1637_v39 = vld [vmem:[%s2612_s12] ss:$0 sm:$0xff] }
 0x726   :  { %1539 = vadd.xlane.f32.xlu0 %v1538_v11 }
 0x7b3   :  { %v1540_v25 = vpop.xlane.xlu0 %1539 }
 0x7b4   :  { %v1541_v3 = vmul.f32 0.0078125, %v1540_v25 }
 0x7b6   :  { %v1542_v26 = vsub.f32 %v1538_v11, %v1541_v3 }
 0x7b8   :  { %v1543_v9 = vmul.f32 %v1542_v26, %v1542_v26 }
 0x7ba   :  { %1544 = vadd.xlane.f32.xlu1 %v1543_v9 }
 0x847   :  { %v1545_v27 = vpop.xlane.xlu1 %1544 }
 0x848   :  { %v1546_v29 = vmul.f32 0.0078125, %v1545_v27 }
 0x84a   :  { %v1547_v31 = vadd.f32 1e-12, %v1546_v29 }
 0x84c   :  { %1914 = vrsqrt.f32 %v1547_v31 }
 0x856   :  { %v1915_v8 = vpop.eup %1914 }
 0x857   :  { %v1549_v28 = vmul.f32 %v1915_v8, %v1542_v26 }
 0x859   :  { %v1556_v40 = vmul.f32 %v1636_v32, %v1549_v28 }
 0x85b   :  { %v1563_v33 = vadd.f32 %v1637_v39, %v1556_v40 }
 0x85d   :  { %1564 = vst [vmem:[#allocation11] sm:$0xff] %v1563_v33 }
 0x85e   :  { %2015 = shalt.err (!%p2012_p8)
}
 0x85f   :  { %s2628_s3 = sld [smem:[#allocation17_spill]] }
 0x865   :  { %s2016_s23 = scalar_lea.hbm %s2628_s3, 128 }
 0x866   :  { %p2017_p9 = scmp.ne.s32.totalorder %s2628_s3, %s2016_s23  ;;  %p2020_p10 = scmp.lt.u32.totalorder %s2016_s23, %s2628_s3 }
 0x868   :  { %p2022_p11 = pnand %p2020_p10, %p2017_p9 }
 0x86a   :  { %2025 = shalt.err (!%p2022_p11)
}
 0x86b   :  { %1574 = dma.vmem_to_hbm [thread:$0]  %s1572_s26, 128, %s2628_s3, [#allocation5]  }
 0x86c   :  { %2032 = dma.done.wait [#allocation5], 128  }
 0x86d   :  { %2033 = vsyncadd [#allocation5], 4294967168 }
 0x86e   :  { %1578 = vsyncpa [#allocation4], 1 }
 0x86f   :  { %1579 = vsyncpa [#allocation7], 1 }
 0x870   :  { %1580 = vsyncpa [#allocation10], 1 }
 0x871   :  { %1581 = vsyncpa [#allocation5], 1 }

</bundles_post_ra>
